<compile_context>
chip_gen: v6e
topology: v6e:2x2x1
jax: 0.10.0
libtpu: 0.0.40
codegen_flags: <defaults>
</compile_context>

<pallas_src>
import functools

import jax
import jax.numpy as jnp
from jax import lax
from jax.experimental import pallas as pl
from jax.experimental.pallas import tpu as pltpu


def _supcon_stream_kernel(q_ref, c_ref, lab_row_ref, lab_col_ref, out_ref,
                          m_sc, l_sc, spa_sc, cnt_sc, *,
                          temperature, base_temperature, n_valid, tq, tk):
    """One (row block, column block) step of SupConLoss (contrast_mode='all').

    q_ref:       [TQ, Dpad] bf16  anchor rows for this row block
    c_ref:       [TK, Dpad] bf16  contrast rows for this column block (streamed)
    lab_row_ref: [TQ, 1]    int32 labels of the anchor rows
    lab_col_ref: [1,  TK]   int32 labels of the contrast rows
    out_ref:     [TQ, 1]    f32   per-anchor-row loss (written on the last column block)
    m/l/spa/cnt: [TQ, 1]    f32   running max / sum_exp / sum(pos*logits) / positive count
    """
    i = pl.program_id(0)
    k = pl.program_id(1)
    neg = jnp.float32(-1e30)   # finite "minus infinity": avoids inf-inf NaNs on padded rows

    @pl.when(k == 0)
    def _():
        m_sc[...] = jnp.full_like(m_sc, neg)
        l_sc[...] = jnp.zeros_like(l_sc)
        spa_sc[...] = jnp.zeros_like(spa_sc)
        cnt_sc[...] = jnp.zeros_like(cnt_sc)

    inv_t = jnp.float32(1.0 / temperature)

    # anchor . contrast over the feature dim: bf16 MXU operands, f32 accumulator,
    # contraction on the last dim of both operands (no explicit transpose).
    adc = lax.dot_general(
        q_ref[...], c_ref[...],
        dimension_numbers=(((1,), (1,)), ((), ())),
        preferred_element_type=jnp.float32) * inv_t                     # [TQ, TK]

    # Validity mask from iota (no N^2 HBM traffic, no bf16-vs-f32 diagonal mismatch):
    # drop the self-contrast column and any padded column.  Iotas kept as [TQ,1]/[1,TK]
    # so only the final boolean mask is a full [TQ,TK] temporary.
    row_ids = i * tq + lax.broadcasted_iota(jnp.int32, (tq, 1), 0)      # [TQ, 1]
    col_ids = k * tk + lax.broadcasted_iota(jnp.int32, (1, tk), 1)      # [1, TK]
    keep = (col_ids != row_ids) & (col_ids < n_valid)                   # [TQ, TK]

    # Masked logits: masked entries get a huge negative value so exp underflows to 0.
    adc = jnp.where(keep, adc, neg)

    # Online (streaming) log-sum-exp over column blocks.
    m_old = m_sc[...]
    m_new = jnp.maximum(m_old, jnp.max(adc, axis=1, keepdims=True))     # [TQ, 1]
    p_sum = jnp.sum(jnp.exp(adc - m_new), axis=1, keepdims=True)        # masked -> exactly 0
    l_sc[...] = l_sc[...] * jnp.exp(m_old - m_new) + p_sum
    m_sc[...] = m_new

    # Positive pairs: same label, excluding self / padded columns.
    pos = keep & (lab_row_ref[...] == lab_col_ref[...])                 # [TQ, TK]
    spa_sc[...] += jnp.sum(jnp.where(pos, adc, 0.0), axis=1, keepdims=True)
    cnt_sc[...] += jnp.sum(jnp.where(pos, 1.0, 0.0), axis=1, keepdims=True)

    @pl.when(k == pl.num_programs(1) - 1)
    def _():
        cnt = cnt_sc[...]
        # sum(pos * log_prob) == sum(pos * adc) - cnt * (row_max + log(sum_exp)).
        # The row-max shift cancels exactly in the forward value, so using the masked max
        # (instead of PyTorch's self-inclusive max) is equivalent and better conditioned.
        mlpp = (spa_sc[...] - cnt * (m_sc[...] + jnp.log(l_sc[...]))) \
            * pl.reciprocal(jnp.maximum(cnt, 1.0), approx=True)
        mlpp = jnp.where(cnt > 0.0, mlpp, 0.0)    # rows with zero positives -> 0, not NaN
        out_ref[...] = (-(temperature / base_temperature)) * mlpp


def _vmem_plan():
    """Generation-aware VMEM budget: (tile-fit budget, vmem_limit_bytes)."""
    try:
        cap = int(pltpu.get_tpu_info().vmem_capacity_bytes)
    except Exception:
        cap = 64 * 2**20                       # conservative (v7x per-TC) fallback
    cap = max(min(cap, 128 * 2**20), 32 * 2**20)
    budget = int(cap * 0.60)                   # what the tile picker is allowed to plan for
    limit = int(cap * 0.75)                    # scoped VMEM handed to Mosaic (headroom left)
    return budget, limit


def _vmem_estimate(tq, tk, dpad):
    """Rough per-step VMEM footprint for the streaming kernel (bytes)."""
    q = 2 * tq * dpad * 2                      # bf16 anchor block, double-buffered
    c = 2 * tk * dpad * 2                      # bf16 contrast block, double-buffered
    slabs = 5 * tq * tk * 4                    # live [TQ,TK] temporaries (logits, masks, exp)
    lab = 2 * (tq * 128 + 8 * tk) * 4          # int32 label blocks incl. layout padding
    scr = 4 * tq * 128 * 4                     # four [TQ,1] f32 scratches (lane-padded)
    out = 2 * tq * 128 * 4                     # output block
    return q + c + slabs + lab + scr + out + (1 << 20)


def _pick_tiles(n, dpad, budget_bytes):
    """Pick (TQ, TK): MXU-sized power-of-two tiles (>=128) that fit the VMEM budget."""
    n128 = max(128, ((n + 127) // 128) * 128)
    tq_cands = [t for t in (512, 256, 128) if t <= n128] or [128]
    tk_cands = [t for t in (4096, 2048, 1024, 512, 256, 128) if t <= n128] or [128]
    for tq in tq_cands:                        # TQ is the main throughput lever
        for tk in tk_cands:                    # then the largest column tile that fits
            if _vmem_estimate(tq, tk, dpad) <= budget_bytes:
                return tq, tk
    # TODO(synk): feature-dim (Dpad) tiling for extremely large feature sizes.
    return 128, 128


def supcon_loss(features, labels=None, mask=None, temperature=0.07,
                contrast_mode="all", base_temperature=0.07):
    """JAX/Pallas equivalent of SupConLoss.forward (contrast_mode='all')."""
    if features.ndim < 3:
        raise ValueError("`features` needs to be [bsz, n_views, ...]")
    if contrast_mode != "all":
        raise ValueError("only contrast_mode='all' implemented")  # TODO(synk): 'one' mode
    if labels is not None and mask is not None:
        raise ValueError("Cannot define both `labels` and `mask`")
    if mask is not None:
        # TODO(synk): arbitrary precomputed-mask path (stream mask column tiles with contrast)
        raise NotImplementedError("explicit `mask` input not supported; pass `labels`")

    bsz, n_views = features.shape[0], features.shape[1]
    feats = features.reshape(bsz, n_views, -1)
    d = feats.shape[-1]
    n = bsz * n_views

    # contrast_feature: view-major concat == torch.cat(torch.unbind(features, 1), 0)
    contrast = jnp.transpose(feats, (1, 0, 2)).reshape(n, d)

    # Per-row labels of the contrast matrix. Eye-mask case == each sample is its own class.
    if labels is None:
        base_labels = jnp.arange(bsz, dtype=jnp.int32)
    else:
        base_labels = jnp.asarray(labels).reshape(-1).astype(jnp.int32)
        if base_labels.shape[0] != bsz:
            raise ValueError("Num of labels does not match num of features")
    row_labels = jnp.tile(base_labels, n_views)                         # [N]

    # Lane/MXU-friendly padding of the feature dim (zeros keep dots exact) and of the row
    # dim (padded columns are masked in-kernel; padded rows dropped before the mean).
    dpad = max(128, ((d + 127) // 128) * 128)
    budget, vmem_limit = _vmem_plan()
    tq, tk = _pick_tiles(n, dpad, budget)
    npad = ((n + max(tq, tk) - 1) // max(tq, tk)) * max(tq, tk)

    contrast = jnp.pad(contrast, ((0, npad - n), (0, dpad - d))).astype(jnp.bfloat16)
    lab = jnp.pad(row_labels, (0, npad - n), constant_values=-1)
    lab_row = lab.reshape(npad, 1)
    lab_col = lab.reshape(1, npad)

    grid = (npad // tq, npad // tk)

    kernel = functools.partial(
        _supcon_stream_kernel,
        temperature=float(temperature),
        base_temperature=float(base_temperature),
        n_valid=int(n), tq=int(tq), tk=int(tk),
    )

    cost = pl.CostEstimate(
        flops=int(2 * npad * npad * dpad),
        transcendentals=int(npad * npad),
        bytes_accessed=int((npad // tq) * npad * dpad * 2      # contrast re-read per row block
                           + npad * dpad * 2                   # anchor rows
                           + npad * 12),                        # labels + per-row output
    )

    per_row = pl.pallas_call(
        kernel,
        out_shape=jax.ShapeDtypeStruct((npad, 1), jnp.float32),
        grid=grid,
        in_specs=[
            pl.BlockSpec((tq, dpad), lambda i, k: (i, 0)),   # anchor row block
            pl.BlockSpec((tk, dpad), lambda i, k: (k, 0)),   # streamed contrast column block
            pl.BlockSpec((tq, 1), lambda i, k: (i, 0)),      # labels of anchor rows
            pl.BlockSpec((1, tk), lambda i, k: (0, k)),      # labels of contrast columns
        ],
        out_specs=pl.BlockSpec((tq, 1), lambda i, k: (i, 0)),
        scratch_shapes=[pltpu.VMEM((tq, 1), jnp.float32)] * 4,   # m, l, sum_pos_adc, pos_cnt
        compiler_params=pltpu.CompilerParams(
            dimension_semantics=("parallel", "arbitrary"),   # rows across TCs, columns reduce
            vmem_limit_bytes=int(vmem_limit),
        ),
        cost_estimate=cost,
    )(contrast, contrast, lab_row, lab_col)

    # mean over anchor_count * batch_size rows == torch.mean(loss.view(anchor_count, bsz));
    # padded rows are dropped before the mean.
    return jnp.mean(per_row[:n, 0])


def _supcon_loss_ref(features, labels=None, temperature=0.07, base_temperature=0.07):
    """Pure-JAX f32 reference mirroring the PyTorch module (contrast_mode='all')."""
    bsz, n_views = features.shape[0], features.shape[1]
    feats = features.reshape(bsz, n_views, -1).astype(jnp.float32)
    cf = jnp.transpose(feats, (1, 0, 2)).reshape(bsz * n_views, -1)
    n = cf.shape[0]
    if labels is None:
        base = jnp.eye(bsz, dtype=jnp.float32)
    else:
        lab = jnp.asarray(labels).reshape(-1, 1)
        base = (lab == lab.T).astype(jnp.float32)
    adc = (cf @ cf.T) / temperature
    logits = adc - jnp.max(adc, axis=1, keepdims=True)
    logits_mask = 1.0 - jnp.eye(n, dtype=jnp.float32)
    pos = jnp.tile(base, (n_views, n_views)) * logits_mask
    exp_logits = jnp.exp(logits) * logits_mask
    log_prob = logits - jnp.log(jnp.sum(exp_logits, axis=1, keepdims=True))
    mlpp = jnp.sum(pos * log_prob, axis=1) / jnp.sum(pos, axis=1)
    return jnp.mean(-(temperature / base_temperature) * mlpp)


if __name__ == "__main__":
    key = jax.random.PRNGKey(0)
    bsz, n_views, dim = 4, 2, 32
    feats = jax.random.normal(key, (bsz, n_views, dim), dtype=jnp.float32)
    # L2-normalize features (typical SupCon usage; keeps logits well-scaled)
    feats = feats / jnp.linalg.norm(feats, axis=-1, keepdims=True)
    labels = jnp.array([0, 1, 0, 1], dtype=jnp.int32)

    # Unsupervised (eye mask) and supervised (labels) cases.
    loss_eye = jax.block_until_ready(supcon_loss(feats))
    loss_lab = jax.block_until_ready(supcon_loss(feats, labels=labels))

    # Tight check against a reference fed bf16-quantized operands (isolates kernel math),
    # loose check against the full-f32 reference (end-to-end incl. the bf16 MXU cast).
    feats_q = feats.astype(jnp.bfloat16).astype(jnp.float32)
    ref_eye_q = _supcon_loss_ref(feats_q)
    ref_lab_q = _supcon_loss_ref(feats_q, labels=labels)
    ref_eye = _supcon_loss_ref(feats)
    ref_lab = _supcon_loss_ref(feats, labels=labels)

    assert jnp.isfinite(loss_eye) and jnp.isfinite(loss_lab), "loss not finite"
    assert jnp.allclose(loss_eye, ref_eye_q, rtol=1e-2, atol=1e-2), (loss_eye, ref_eye_q)
    assert jnp.allclose(loss_lab, ref_lab_q, rtol=1e-2, atol=1e-2), (loss_lab, ref_lab_q)
    assert jnp.allclose(loss_eye, ref_eye, rtol=5e-2, atol=5e-2), (loss_eye, ref_eye)
    assert jnp.allclose(loss_lab, ref_lab, rtol=5e-2, atol=5e-2), (loss_lab, ref_lab)
    print("KERNEL_OK")
</pallas_src>

<mosaic_0001>
module attributes {stable_mosaic.version = 11 : i64} {
  func.func @_supcon_stream_kernel(%arg0: i32, %arg1: i32, %arg2: memref<128x128xbf16, #tpu.memory_space<vmem>>, %arg3: memref<128x128xbf16, #tpu.memory_space<vmem>>, %arg4: memref<128x1xi32, #tpu.memory_space<vmem>>, %arg5: memref<1x128xi32, #tpu.memory_space<vmem>>, %arg6: memref<128x1xf32, #tpu.memory_space<vmem>>, %arg7: memref<128x1xf32, #tpu.memory_space<vmem>>, %arg8: memref<128x1xf32, #tpu.memory_space<vmem>>, %arg9: memref<128x1xf32, #tpu.memory_space<vmem>>, %arg10: memref<128x1xf32, #tpu.memory_space<vmem>>) attributes {dimension_semantics = [#tpu.dimension_semantics<parallel>, #tpu.dimension_semantics<arbitrary>], iteration_bounds = array<i64: 1, 1>, scalar_prefetch = 0 : i64, scratch_operands = 4 : i64, tpu.core_type = #tpu.core_type<tc>, window_params = [{transform_indices = @transform_0, window_bounds = array<i64: 128, 128>}, {transform_indices = @transform_1, window_bounds = array<i64: 128, 128>}, {transform_indices = @transform_2, window_bounds = array<i64: 128, 1>}, {transform_indices = @transform_3, window_bounds = array<i64: 1, 128>}, {transform_indices = @transform_4, window_bounds = array<i64: 128, 1>}]} {
    %c0_i32 = arith.constant 0 : i32
    %0 = arith.cmpi eq, %arg1, %c0_i32 : i32
    %1 = arith.extui %0 : i1 to i32
    %cst = arith.constant -1.000000e+30 : f32
    %c0_i32_0 = arith.constant 0 : i32
    %2 = arith.cmpi ne, %1, %c0_i32_0 : i32
    scf.if %2 {
      %65 = vector.broadcast %cst : f32 to vector<128x1xf32>
      %c0_37 = arith.constant 0 : index
      %c0_38 = arith.constant 0 : index
      %66 = vector.load %arg7[%c0_37, %c0_38] : memref<128x1xf32, #tpu.memory_space<vmem>>, vector<128x1xf32>
      tpu.vector_store %arg7[%c0_37, %c0_38], %65 {strides = array<i32>} : memref<128x1xf32, #tpu.memory_space<vmem>>, vector<128x1xf32>,
      %cst_39 = arith.constant 0.000000e+00 : f32
      %67 = vector.broadcast %cst_39 : f32 to vector<128x1xf32>
      %c0_40 = arith.constant 0 : index
      %c0_41 = arith.constant 0 : index
      %68 = vector.load %arg8[%c0_40, %c0_41] : memref<128x1xf32, #tpu.memory_space<vmem>>, vector<128x1xf32>
      tpu.vector_store %arg8[%c0_40, %c0_41], %67 {strides = array<i32>} : memref<128x1xf32, #tpu.memory_space<vmem>>, vector<128x1xf32>,
      %cst_42 = arith.constant 0.000000e+00 : f32
      %69 = vector.broadcast %cst_42 : f32 to vector<128x1xf32>
      %c0_43 = arith.constant 0 : index
      %c0_44 = arith.constant 0 : index
      %70 = vector.load %arg9[%c0_43, %c0_44] : memref<128x1xf32, #tpu.memory_space<vmem>>, vector<128x1xf32>
      tpu.vector_store %arg9[%c0_43, %c0_44], %69 {strides = array<i32>} : memref<128x1xf32, #tpu.memory_space<vmem>>, vector<128x1xf32>,
      %cst_45 = arith.constant 0.000000e+00 : f32
      %71 = vector.broadcast %cst_45 : f32 to vector<128x1xf32>
      %c0_46 = arith.constant 0 : index
      %c0_47 = arith.constant 0 : index
      %72 = vector.load %arg10[%c0_46, %c0_47] : memref<128x1xf32, #tpu.memory_space<vmem>>, vector<128x1xf32>
      tpu.vector_store %arg10[%c0_46, %c0_47], %71 {strides = array<i32>} : memref<128x1xf32, #tpu.memory_space<vmem>>, vector<128x1xf32>,
    } else {
    }
    %c0 = arith.constant 0 : index
    %c0_1 = arith.constant 0 : index
    %3 = vector.load %arg2[%c0, %c0_1] : memref<128x128xbf16, #tpu.memory_space<vmem>>, vector<128x128xbf16>
    %c0_2 = arith.constant 0 : index
    %c0_3 = arith.constant 0 : index
    %4 = vector.load %arg3[%c0_2, %c0_3] : memref<128x128xbf16, #tpu.memory_space<vmem>>, vector<128x128xbf16>
    %cst_4 = arith.constant dense<0.000000e+00> : vector<128x128xf32>
    %5 = tpu.matmul %3, %4, %cst_4 {dimension_numbers = #tpu.dot_dimension_numbers<[1], [1], [0], [0], [0, 0, 1, 0], [], []>} : vector<128x128xbf16>, vector<128x128xbf16>, vector<128x128xf32> -> vector<128x128xf32>
    %cst_5 = arith.constant 14.2857141 : f32
    %6 = vector.broadcast %cst_5 : f32 to vector<128x128xf32>
    %7 = arith.mulf %5, %6 : vector<128x128xf32>
    %c128_i32 = arith.constant 128 : i32
    %8 = arith.muli %arg0, %c128_i32 : i32
    %9 = tpu.iota {dimensions = array<i32: 0>} : vector<128x1xi32>
    %10 = vector.broadcast %8 : i32 to vector<128x1xi32>
    %11 = arith.addi %10, %9 : vector<128x1xi32>
    %c128_i32_6 = arith.constant 128 : i32
    %12 = arith.muli %arg1, %c128_i32_6 : i32
    %13 = tpu.iota {dimensions = array<i32: 1>} : vector<1x128xi32>
    %14 = vector.broadcast %12 : i32 to vector<1x128xi32>
    %15 = arith.addi %14, %13 : vector<1x128xi32>
    %16 = vector.broadcast %15 : vector<1x128xi32> to vector<128x128xi32>
    %17 = vector.broadcast %11 : vector<128x1xi32> to vector<128x128xi32>
    %18 = arith.cmpi ne, %16, %17 : vector<128x128xi32>
    %c8_i32 = arith.constant 8 : i32
    %19 = vector.broadcast %c8_i32 : i32 to vector<1x128xi32>
    %20 = arith.cmpi slt, %15, %19 : vector<1x128xi32>
    %21 = vector.broadcast %20 : vector<1x128xi1> to vector<128x128xi1>
    %22 = arith.andi %18, %21 : vector<128x128xi1>
    %cst_7 = arith.constant -1.000000e+30 : f32
    %23 = vector.broadcast %cst_7 : f32 to vector<128x128xf32>
    %24 = arith.select %22, %7, %23 : vector<128x128xi1>, vector<128x128xf32>
    %c0_8 = arith.constant 0 : index
    %c0_9 = arith.constant 0 : index
    %25 = vector.load %arg7[%c0_8, %c0_9] : memref<128x1xf32, #tpu.memory_space<vmem>>, vector<128x1xf32>
    %cst_10 = arith.constant dense<0xFF800000> : vector<128xf32>
    %26 = vector.multi_reduction <maximumf>, %24, %cst_10 [1] : vector<128x128xf32> to vector<128xf32>
    %27 = vector.shape_cast %26 : vector<128xf32> to vector<128x1xf32>
    %28 = arith.maximumf %25, %27 : vector<128x1xf32>
    %29 = vector.broadcast %28 : vector<128x1xf32> to vector<128x128xf32>
    %30 = arith.subf %24, %29 : vector<128x128xf32>
    %31 = math.exp %30 : vector<128x128xf32>
    %cst_11 = arith.constant dense<0.000000e+00> : vector<128xf32>
    %32 = vector.multi_reduction <add>, %31, %cst_11 [1] : vector<128x128xf32> to vector<128xf32>
    %33 = vector.shape_cast %32 : vector<128xf32> to vector<128x1xf32>
    %c0_12 = arith.constant 0 : index
    %c0_13 = arith.constant 0 : index
    %34 = vector.load %arg8[%c0_12, %c0_13] : memref<128x1xf32, #tpu.memory_space<vmem>>, vector<128x1xf32>
    %35 = arith.subf %25, %28 : vector<128x1xf32>
    %36 = math.exp %35 : vector<128x1xf32>
    %37 = arith.mulf %34, %36 : vector<128x1xf32>
    %38 = arith.addf %37, %33 : vector<128x1xf32>
    %c0_14 = arith.constant 0 : index
    %c0_15 = arith.constant 0 : index
    %39 = vector.load %arg8[%c0_14, %c0_15] : memref<128x1xf32, #tpu.memory_space<vmem>>, vector<128x1xf32>
    tpu.vector_store %arg8[%c0_14, %c0_15], %38 {strides = array<i32>} : memref<128x1xf32, #tpu.memory_space<vmem>>, vector<128x1xf32>,
    %c0_16 = arith.constant 0 : index
    %c0_17 = arith.constant 0 : index
    %40 = vector.load %arg7[%c0_16, %c0_17] : memref<128x1xf32, #tpu.memory_space<vmem>>, vector<128x1xf32>
    tpu.vector_store %arg7[%c0_16, %c0_17], %28 {strides = array<i32>} : memref<128x1xf32, #tpu.memory_space<vmem>>, vector<128x1xf32>,
    %c0_18 = arith.constant 0 : index
    %c0_19 = arith.constant 0 : index
    %41 = vector.load %arg4[%c0_18, %c0_19] : memref<128x1xi32, #tpu.memory_space<vmem>>, vector<128x1xi32>
    %c0_20 = arith.constant 0 : index
    %c0_21 = arith.constant 0 : index
    %42 = vector.load %arg5[%c0_20, %c0_21] : memref<1x128xi32, #tpu.memory_space<vmem>>, vector<1x128xi32>
    %43 = vector.broadcast %41 : vector<128x1xi32> to vector<128x128xi32>
    %44 = vector.broadcast %42 : vector<1x128xi32> to vector<128x128xi32>
    %45 = arith.cmpi eq, %43, %44 : vector<128x128xi32>
    %46 = arith.andi %22, %45 : vector<128x128xi1>
    %c0_22 = arith.constant 0 : index
    %c0_23 = arith.constant 0 : index
    %47 = vector.load %arg9[%c0_22, %c0_23] : memref<128x1xf32, #tpu.memory_space<vmem>>, vector<128x1xf32>
    %cst_24 = arith.constant 0.000000e+00 : f32
    %48 = vector.broadcast %cst_24 : f32 to vector<128x128xf32>
    %49 = arith.select %46, %24, %48 : vector<128x128xi1>, vector<128x128xf32>
    %cst_25 = arith.constant dense<0.000000e+00> : vector<128xf32>
    %50 = vector.multi_reduction <add>, %49, %cst_25 [1] : vector<128x128xf32> to vector<128xf32>
    %51 = vector.shape_cast %50 : vector<128xf32> to vector<128x1xf32>
    %52 = arith.addf %47, %51 : vector<128x1xf32>
    %c0_26 = arith.constant 0 : index
    %c0_27 = arith.constant 0 : index
    %53 = vector.load %arg9[%c0_26, %c0_27] : memref<128x1xf32, #tpu.memory_space<vmem>>, vector<128x1xf32>
    tpu.vector_store %arg9[%c0_26, %c0_27], %52 {strides = array<i32>} : memref<128x1xf32, #tpu.memory_space<vmem>>, vector<128x1xf32>,
    %c0_28 = arith.constant 0 : index
    %c0_29 = arith.constant 0 : index
    %54 = vector.load %arg10[%c0_28, %c0_29] : memref<128x1xf32, #tpu.memory_space<vmem>>, vector<128x1xf32>
    %cst_30 = arith.constant 1.000000e+00 : f32
    %cst_31 = arith.constant 0.000000e+00 : f32
    %55 = vector.broadcast %cst_30 : f32 to vector<128x128xf32>
    %56 = vector.broadcast %cst_31 : f32 to vector<128x128xf32>
    %57 = arith.select %46, %55, %56 : vector<128x128xi1>, vector<128x128xf32>
    %cst_32 = arith.constant dense<0.000000e+00> : vector<128xf32>
    %58 = vector.multi_reduction <add>, %57, %cst_32 [1] : vector<128x128xf32> to vector<128xf32>
    %59 = vector.shape_cast %58 : vector<128xf32> to vector<128x1xf32>
    %60 = arith.addf %54, %59 : vector<128x1xf32>
    %c0_33 = arith.constant 0 : index
    %c0_34 = arith.constant 0 : index
    %61 = vector.load %arg10[%c0_33, %c0_34] : memref<128x1xf32, #tpu.memory_space<vmem>>, vector<128x1xf32>
    tpu.vector_store %arg10[%c0_33, %c0_34], %60 {strides = array<i32>} : memref<128x1xf32, #tpu.memory_space<vmem>>, vector<128x1xf32>,
    %c0_i32_35 = arith.constant 0 : i32
    %62 = arith.cmpi eq, %arg1, %c0_i32_35 : i32
    %63 = arith.extui %62 : i1 to i32
    %c0_i32_36 = arith.constant 0 : i32
    %64 = arith.cmpi ne, %63, %c0_i32_36 : i32
    scf.if %64 {
      %c0_37 = arith.constant 0 : index
      %c0_38 = arith.constant 0 : index
      %65 = vector.load %arg10[%c0_37, %c0_38] : memref<128x1xf32, #tpu.memory_space<vmem>>, vector<128x1xf32>
      %c0_39 = arith.constant 0 : index
      %c0_40 = arith.constant 0 : index
      %66 = vector.load %arg9[%c0_39, %c0_40] : memref<128x1xf32, #tpu.memory_space<vmem>>, vector<128x1xf32>
      %c0_41 = arith.constant 0 : index
      %c0_42 = arith.constant 0 : index
      %67 = vector.load %arg7[%c0_41, %c0_42] : memref<128x1xf32, #tpu.memory_space<vmem>>, vector<128x1xf32>
      %c0_43 = arith.constant 0 : index
      %c0_44 = arith.constant 0 : index
      %68 = vector.load %arg8[%c0_43, %c0_44] : memref<128x1xf32, #tpu.memory_space<vmem>>, vector<128x1xf32>
      %69 = math.log %68 : vector<128x1xf32>
      %70 = arith.addf %67, %69 : vector<128x1xf32>
      %71 = arith.mulf %65, %70 : vector<128x1xf32>
      %72 = arith.subf %66, %71 : vector<128x1xf32>
      %cst_45 = arith.constant 1.000000e+00 : f32
      %73 = vector.broadcast %cst_45 : f32 to vector<128x1xf32>
      %74 = arith.maximumf %65, %73 : vector<128x1xf32>
      %75 = tpu.reciprocal %74 {approx = true} : vector<128x1xf32> -> vector<128x1xf32>
      %76 = arith.mulf %72, %75 : vector<128x1xf32>
      %cst_46 = arith.constant 0.000000e+00 : f32
      %77 = vector.broadcast %cst_46 : f32 to vector<128x1xf32>
      %78 = arith.cmpf ogt, %65, %77 : vector<128x1xf32>
      %cst_47 = arith.constant 0.000000e+00 : f32
      %79 = vector.broadcast %cst_47 : f32 to vector<128x1xf32>
      %80 = arith.select %78, %76, %79 : vector<128x1xi1>, vector<128x1xf32>
      %cst_48 = arith.constant -1.000000e+00 : f32
      %81 = vector.broadcast %cst_48 : f32 to vector<128x1xf32>
      %82 = arith.mulf %81, %80 : vector<128x1xf32>
      %c0_49 = arith.constant 0 : index
      %c0_50 = arith.constant 0 : index
      %83 = vector.load %arg6[%c0_49, %c0_50] : memref<128x1xf32, #tpu.memory_space<vmem>>, vector<128x1xf32>
      tpu.vector_store %arg6[%c0_49, %c0_50], %82 {strides = array<i32>} : memref<128x1xf32, #tpu.memory_space<vmem>>, vector<128x1xf32>,
    } else {
    }
    return
  }
  func.func @transform_0(%arg0: i32, %arg1: i32) -> (i32, i32) {
    %c0_i32 = arith.constant 0 : i32
    %c0_i32_0 = arith.constant 0 : i32
    return %arg0, %c0_i32 : i32, i32
  }
  func.func @transform_1(%arg0: i32, %arg1: i32) -> (i32, i32) {
    %c0_i32 = arith.constant 0 : i32
    %c0_i32_0 = arith.constant 0 : i32
    return %arg1, %c0_i32 : i32, i32
  }
  func.func @transform_2(%arg0: i32, %arg1: i32) -> (i32, i32) {
    %c0_i32 = arith.constant 0 : i32
    %c0_i32_0 = arith.constant 0 : i32
    return %arg0, %c0_i32 : i32, i32
  }
  func.func @transform_3(%arg0: i32, %arg1: i32) -> (i32, i32) {
    %c0_i32 = arith.constant 0 : i32
    %c0_i32_0 = arith.constant 0 : i32
    return %c0_i32, %arg1 : i32, i32
  }
  func.func @transform_4(%arg0: i32, %arg1: i32) -> (i32, i32) {
    %c0_i32 = arith.constant 0 : i32
    %c0_i32_0 = arith.constant 0 : i32
    return %arg0, %c0_i32 : i32, i32
  }
}

</mosaic_0001>

<bundles_post_ra>
// kernel: tpu_custom_call.1
= control target key start
LH: loop header
LB: loop body
LE: loop exit
PB: predicated region body
PF: predicated region fallthrough
CT: control target
= control target key end

     0   :  { %v1558_v1 = vmov 0   ;;  %v329_v33 = vlaneseq  ;;  %v2710_v46 = vmov 0.0   ;;  %v2738_v48 = vmov 0  ;;  %s2699_s1 = inlined_call_operand.vmem [shape: bf16[128,128], index: 1, kind: input, shape index: {}]   ;;  %s2700_s0 = inlined_call_operand.vmem [shape: bf16[128,128], index: 0, kind: input, shape index: {}]   ;;  %s2701_s2 = inlined_call_operand.vmem [shape: s32[128,1], index: 2, kind: input, shape index: {}]   ;;  %s2702_s3 = inlined_call_operand.vmem [shape: s32[1,128], index: 3, kind: input, shape index: {}]   ;;  %s2703_s4 = inlined_call_operand.vmem [shape: f32[128,1], index: 4, kind: output, shape index: {}]  }
   0x1   :  { %v1414_v0 = vld [vmem:[%s2699_s1 + $0x38] sm:$0xff]   ;;  %1412 = vset.pattern.permute.xlu1 %v1558_v1  ;;  %1413 = vset.pattern.permute.xlu0 %v1558_v1  ;;  %v1415_v2 = vld [vmem:[%s2699_s1 + $0x30] sm:$0xff]   ;;  %v1416_v3 = vld [vmem:[%s2699_s1 + $0x28] sm:$0xff]   ;;  %v2740_v53 = vmov 0  ;;  %v2744_v58 = vmov 0  ;;  %v2748_v63 = vmov 0 }
   0x2   :  { %1361 = vmatprep.subr.bf16.mxu0 %v1414_v0  ;;  %1393 = vmatprep.subr.bf16.mxu1 %v1414_v0  ;;  %v1422_v4 = vld [vmem:[%s2700_s0] sm:$0xff]   ;;  %v773_v8 = vld [vmem:[%s2701_s2 + $0x8] sm:$0xff]  ;;  %v774_v9 = vld [vmem:[%s2701_s2 + $0x10] sm:$0xff]  ;;  %v1682_v34 = vshrl.u32 %v329_v33, 7  ;;  %v1684_v35 = vand.u32 127, %v329_v33  ;;  %vm2704_vm12 = vcmask 7168  }
   0x3   :  { %1362 = vmatpush3.bf16.xpose.msra.mxu0 %v1414_v0  ;;  %1401 = vmatpush3.bf16.xpose.msra.mxu1 %v1414_v0  ;;  %v1423_v5 = vld [vmem:[%s2700_s0 + $0x20] sm:$0xff]   ;;  %v775_v11 = vld [vmem:[%s2701_s2 + $0x18] sm:$0xff]  ;;  %v778_v12 = vld [vmem:[%s2701_s2 + $0x30] sm:$0xff]  ;;  %71 = vst.msk [vmem:[#allocation5] sm:$0xff] %vm2704_vm12, %v2710_v46 }
   0x4   :  { %1363 = vmatprep.subr.bf16.mxu0 %v1415_v2  ;;  %1394 = vmatprep.subr.bf16.mxu1 %v1415_v2  ;;  %v1417_v6 = vld [vmem:[%s2699_s1 + $0x20] sm:$0xff]   ;;  %v1418_v13 = vld [vmem:[%s2699_s1 + $0x18] sm:$0xff]   ;;  %v777_v14 = vld [vmem:[%s2701_s2 + $0x28] sm:$0xff]  ;;  %v331_v36 = vadd.s32 8, %v1682_v34  ;;  %v332_v37 = vadd.s32 16, %v1682_v34  ;;  %vm368_vm0 = vcmp.ne.s32.totalorder %v1684_v35, %v1682_v34  ;;  %vm384_vm1 = vcmp.lt.s32.totalorder %v1684_v35, 8 }
   0x5   :  { %1377 = vmatprep.mubr.bf16.mxu0 %v1422_v4  ;;  %1385 = vmatprep.mubr.bf16.mxu1 %v1423_v5  ;;  %v772_v7 = vld [vmem:[%s2701_s2] sm:$0xff]  ;;  %v779_v16 = vld [vmem:[%s2701_s2 + $0x38] sm:$0xff]  ;;  %v782_v17 = vld [vmem:[%s2701_s2 + $0x50] sm:$0xff]  ;;  %v333_v44 = vadd.s32 24, %v1682_v34  ;;  %v335_v52 = vadd.s32 40, %v1682_v34  ;;  %39 = vst.msk [vmem:[#allocation3] sm:$0xff] %vm2704_vm12, %v2710_v46 }
   0x6   :  { %790 = vperm.xlu1 %1412, %v772_v7   ;;  %793 = vperm.xlu0 %1413, %v773_v8   ;;  %v776_v10 = vld [vmem:[%s2701_s2 + $0x20] sm:$0xff]  ;;  %v1419_v18 = vld [vmem:[%s2699_s1 + $0x10] sm:$0xff]   ;;  %v781_v19 = vld [vmem:[%s2701_s2 + $0x48] sm:$0xff]  ;;  %vm369_vm2 = vcmp.ne.s32.totalorder %v1684_v35, %v331_v36  ;;  %vm370_vm3 = vcmp.ne.s32.totalorder %v1684_v35, %v332_v37  ;;  %40 = vst.msk [vmem:[#allocation3 + $0x8] sm:$0xff] %vm2704_vm12, %v2710_v46  ;;  %v1560_v7 = vmov -1e+30  }
   0x7   :  { %v780_v15 = vld [vmem:[%s2701_s2 + $0x40] sm:$0xff]  ;;  %v783_v21 = vld [vmem:[%s2701_s2 + $0x58] sm:$0xff]  ;;  %v786_v22 = vld [vmem:[%s2701_s2 + $0x70] sm:$0xff]  ;;  %vm371_vm13 = vcmp.ne.s32.totalorder %v1684_v35, %v333_v44  ;;  %41 = vst.msk [vmem:[#allocation3 + $0x10] sm:$0xff] %vm2704_vm12, %v2710_v46  ;;  %v340_v8 = vadd.s32 80, %v1682_v34  ;;  %v344_v57 = vadd.s32 112, %v1682_v34 }
   0x8   :  { %v784_v20 = vld [vmem:[%s2701_s2 + $0x60] sm:$0xff]  ;;  %v1420_v23 = vld [vmem:[%s2699_s1 + $0x8] sm:$0xff]   ;;  %v787_v25 = vld [vmem:[%s2701_s2 + $0x78] sm:$0xff]  ;;  %42 = vst.msk [vmem:[#allocation3 + $0x18] sm:$0xff] %vm2704_vm12, %v2710_v46 }
   0x9   :  { %v785_v24 = vld [vmem:[%s2701_s2 + $0x68] sm:$0xff]  ;;  %v1421_v26 = vld [vmem:[%s2699_s1] sm:$0xff]   ;;  %v1426_v29 = vld [vmem:[%s2700_s0 + $0x10] sm:$0xff]   ;;  %43 = vst.msk [vmem:[#allocation3 + $0x20] sm:$0xff] %vm2704_vm12, %v2710_v46 }
   0xa   :  { %796 = vperm.xlu1 %1412, %v774_v9   ;;  %802 = vperm.xlu0 %1413, %v776_v10   ;;  %v1424_v27 = vld [vmem:[%s2700_s0 + $0x8] sm:$0xff]   ;;  %v1427_v30 = vld [vmem:[%s2700_s0 + $0x30] sm:$0xff]   ;;  %v1428_v31 = vld [vmem:[%s2700_s0 + $0x18] sm:$0xff]   ;;  %44 = vst.msk [vmem:[#allocation3 + $0x28] sm:$0xff] %vm2704_vm12, %v2710_v46 }
   0xb   :  { %1364 = vmatpush3.bf16.xpose.msra.mxu0 %v1415_v2  ;;  %1402 = vmatpush3.bf16.xpose.msra.mxu1 %v1415_v2  ;;  %v1425_v28 = vld [vmem:[%s2700_s0 + $0x28] sm:$0xff]   ;;  %v1429_v32 = vld [vmem:[%s2700_s0 + $0x38] sm:$0xff]   ;;  %v1695_v38 = vld [vmem:[%s2702_s3] ss:$0 sm:$0xff]  ;;  %45 = vst.msk [vmem:[#allocation3 + $0x30] sm:$0xff] %vm2704_vm12, %v2710_v46 }
   0xc   :  { %1365 = vmatprep.subr.bf16.mxu0 %v1416_v3  ;;  %1395 = vmatprep.subr.bf16.mxu1 %v1416_v3  ;;  %vm1700_vm4 = vmand %vm368_vm0, %vm384_vm1  ;;  %46 = vst.msk [vmem:[#allocation3 + $0x38] sm:$0xff] %vm2704_vm12, %v2710_v46 }
   0xd   :  { %vm1706_vm5 = vmand %vm369_vm2, %vm384_vm1  ;;  %47 = vst.msk [vmem:[#allocation3 + $0x40] sm:$0xff] %vm2704_vm12, %v2710_v46 }
   0xe   :  { %799 = vperm.xlu1 %1412, %v775_v11   ;;  %808 = vperm.xlu0 %1413, %v778_v12   ;;  %vm1714_vm8 = vmand %vm370_vm3, %vm384_vm1  ;;  %vm373_vm3 = vcmp.ne.s32.totalorder %v1684_v35, %v335_v52  ;;  %48 = vst.msk [vmem:[#allocation3 + $0x48] sm:$0xff] %vm2704_vm12, %v2710_v46 }
   0xf   :  { %vm1757_vm15 = vmand %vm371_vm13, %vm384_vm1  ;;  %49 = vst.msk [vmem:[#allocation3 + $0x50] sm:$0xff] %vm2704_vm12, %v2710_v46 }
  0x10   :  { %50 = vst.msk [vmem:[#allocation3 + $0x58] sm:$0xff] %vm2704_vm12, %v2710_v46  ;;  %51 = vst.msk [vmem:[#allocation3 + $0x60] sm:$0xff] %vm2704_vm12, %v2710_v46 }
  0x11   :  { %52 = vst.msk [vmem:[#allocation3 + $0x68] sm:$0xff] %vm2704_vm12, %v2710_v46  ;;  %53 = vst.msk [vmem:[#allocation3 + $0x70] sm:$0xff] %vm2704_vm12, %v2710_v46 }
  0x12   :  { %805 = vperm.xlu1 %1412, %v777_v14   ;;  %814 = vperm.xlu0 %1413, %v780_v15   ;;  %54 = vst.msk [vmem:[#allocation3 + $0x78] sm:$0xff] %vm2704_vm12, %v2710_v46  ;;  %55 = vst.msk [vmem:[#allocation4] sm:$0xff] %vm2704_vm12, %v2710_v46 }
  0x13   :  { %1366 = vmatpush3.bf16.xpose.msra.mxu0 %v1416_v3  ;;  %1403 = vmatpush3.bf16.xpose.msra.mxu1 %v1416_v3  ;;  %56 = vst.msk [vmem:[#allocation4 + $0x8] sm:$0xff] %vm2704_vm12, %v2710_v46  ;;  %57 = vst.msk [vmem:[#allocation4 + $0x10] sm:$0xff] %vm2704_vm12, %v2710_v46 }
  0x14   :  { %1367 = vmatprep.subr.bf16.mxu0 %v1417_v6  ;;  %1396 = vmatprep.subr.bf16.mxu1 %v1417_v6  ;;  %58 = vst.msk [vmem:[#allocation4 + $0x18] sm:$0xff] %vm2704_vm12, %v2710_v46  ;;  %59 = vst.msk [vmem:[#allocation4 + $0x20] sm:$0xff] %vm2704_vm12, %v2710_v46 }
  0x15   :  { %60 = vst.msk [vmem:[#allocation4 + $0x28] sm:$0xff] %vm2704_vm12, %v2710_v46  ;;  %61 = vst.msk [vmem:[#allocation4 + $0x30] sm:$0xff] %vm2704_vm12, %v2710_v46 }
  0x16   :  { %811 = vperm.xlu1 %1412, %v779_v16   ;;  %820 = vperm.xlu0 %1413, %v782_v17   ;;  %62 = vst.msk [vmem:[#allocation4 + $0x38] sm:$0xff] %vm2704_vm12, %v2710_v46  ;;  %63 = vst.msk [vmem:[#allocation4 + $0x40] sm:$0xff] %vm2704_vm12, %v2710_v46 }
  0x17   :  { %64 = vst.msk [vmem:[#allocation4 + $0x48] sm:$0xff] %vm2704_vm12, %v2710_v46  ;;  %65 = vst.msk [vmem:[#allocation4 + $0x50] sm:$0xff] %vm2704_vm12, %v2710_v46 }
  0x18   :  { %66 = vst.msk [vmem:[#allocation4 + $0x58] sm:$0xff] %vm2704_vm12, %v2710_v46  ;;  %67 = vst.msk [vmem:[#allocation4 + $0x60] sm:$0xff] %vm2704_vm12, %v2710_v46 }
  0x19   :  { %68 = vst.msk [vmem:[#allocation4 + $0x68] sm:$0xff] %vm2704_vm12, %v2710_v46  ;;  %69 = vst.msk [vmem:[#allocation4 + $0x70] sm:$0xff] %vm2704_vm12, %v2710_v46 }
  0x1a   :  { %817 = vperm.xlu1 %1412, %v781_v19   ;;  %826 = vperm.xlu0 %1413, %v784_v20   ;;  %70 = vst.msk [vmem:[#allocation4 + $0x78] sm:$0xff] %vm2704_vm12, %v2710_v46  ;;  %72 = vst.msk [vmem:[#allocation5 + $0x8] sm:$0xff] %vm2704_vm12, %v2710_v46 }
  0x1b   :  { %1368 = vmatpush3.bf16.xpose.msra.mxu0 %v1417_v6  ;;  %1404 = vmatpush3.bf16.xpose.msra.mxu1 %v1417_v6  ;;  %73 = vst.msk [vmem:[#allocation5 + $0x10] sm:$0xff] %vm2704_vm12, %v2710_v46  ;;  %74 = vst.msk [vmem:[#allocation5 + $0x18] sm:$0xff] %vm2704_vm12, %v2710_v46 }
  0x1c   :  { %1369 = vmatprep.subr.bf16.mxu0 %v1418_v13  ;;  %1397 = vmatprep.subr.bf16.mxu1 %v1418_v13  ;;  %75 = vst.msk [vmem:[#allocation5 + $0x20] sm:$0xff] %vm2704_vm12, %v2710_v46  ;;  %76 = vst.msk [vmem:[#allocation5 + $0x28] sm:$0xff] %vm2704_vm12, %v2710_v46 }
  0x1d   :  { %77 = vst.msk [vmem:[#allocation5 + $0x30] sm:$0xff] %vm2704_vm12, %v2710_v46  ;;  %78 = vst.msk [vmem:[#allocation5 + $0x38] sm:$0xff] %vm2704_vm12, %v2710_v46 }
  0x1e   :  { %823 = vperm.xlu1 %1412, %v783_v21   ;;  %832 = vperm.xlu0 %1413, %v786_v22   ;;  %79 = vst.msk [vmem:[#allocation5 + $0x40] sm:$0xff] %vm2704_vm12, %v2710_v46  ;;  %80 = vst.msk [vmem:[#allocation5 + $0x48] sm:$0xff] %vm2704_vm12, %v2710_v46  ;;  %v341_v22 = vadd.s32 88, %v1682_v34 }
  0x1f   :  { %81 = vst.msk [vmem:[#allocation5 + $0x50] sm:$0xff] %vm2704_vm12, %v2710_v46  ;;  %82 = vst.msk [vmem:[#allocation5 + $0x58] sm:$0xff] %vm2704_vm12, %v2710_v46 }
  0x20   :  { %83 = vst.msk [vmem:[#allocation5 + $0x60] sm:$0xff] %vm2704_vm12, %v2710_v46  ;;  %84 = vst.msk [vmem:[#allocation5 + $0x68] sm:$0xff] %vm2704_vm12, %v2710_v46 }
  0x21   :  { %85 = vst.msk [vmem:[#allocation5 + $0x70] sm:$0xff] %vm2704_vm12, %v2710_v46  ;;  %86 = vst.msk [vmem:[#allocation5 + $0x78] sm:$0xff] %vm2704_vm12, %v2710_v46 }
  0x22   :  { %829 = vperm.xlu1 %1412, %v785_v24   ;;  %33 = vst.msk [vmem:[#allocation2 + $0x50] sm:$0xff] %vm2704_vm12, %v1560_v7  ;;  %23 = vst.msk [vmem:[#allocation2] sm:$0xff] %vm2704_vm12, %v1560_v7 }
  0x23   :  { %1370 = vmatpush3.bf16.xpose.msra.mxu0 %v1418_v13  ;;  %1405 = vmatpush3.bf16.xpose.msra.mxu1 %v1418_v13  ;;  %24 = vst.msk [vmem:[#allocation2 + $0x8] sm:$0xff] %vm2704_vm12, %v1560_v7  ;;  %25 = vst.msk [vmem:[#allocation2 + $0x10] sm:$0xff] %vm2704_vm12, %v1560_v7 }
  0x24   :  { %1371 = vmatprep.subr.bf16.mxu0 %v1419_v18  ;;  %1398 = vmatprep.subr.bf16.mxu1 %v1419_v18  ;;  %26 = vst.msk [vmem:[#allocation2 + $0x18] sm:$0xff] %vm2704_vm12, %v1560_v7  ;;  %27 = vst.msk [vmem:[#allocation2 + $0x20] sm:$0xff] %vm2704_vm12, %v1560_v7 }
  0x25   :  { %28 = vst.msk [vmem:[#allocation2 + $0x28] sm:$0xff] %vm2704_vm12, %v1560_v7  ;;  %29 = vst.msk [vmem:[#allocation2 + $0x30] sm:$0xff] %vm2704_vm12, %v1560_v7 }
  0x26   :  { %835 = vperm.xlu1 %1412, %v787_v25   ;;  %30 = vst.msk [vmem:[#allocation2 + $0x38] sm:$0xff] %vm2704_vm12, %v1560_v7  ;;  %31 = vst.msk [vmem:[#allocation2 + $0x40] sm:$0xff] %vm2704_vm12, %v1560_v7  ;;  %v979_v45 = vld [vmem:[#allocation5 + $0x50] sm:$0xff] }
  0x27   :  { %32 = vst.msk [vmem:[#allocation2 + $0x48] sm:$0xff] %vm2704_vm12, %v1560_v7  ;;  %34 = vst.msk [vmem:[#allocation2 + $0x58] sm:$0xff] %vm2704_vm12, %v1560_v7 }
  0x28   :  { %35 = vst.msk [vmem:[#allocation2 + $0x60] sm:$0xff] %vm2704_vm12, %v1560_v7  ;;  %36 = vst.msk [vmem:[#allocation2 + $0x68] sm:$0xff] %vm2704_vm12, %v1560_v7 }
  0x29   :  { %37 = vst.msk [vmem:[#allocation2 + $0x70] sm:$0xff] %vm2704_vm12, %v1560_v7  ;;  %38 = vst.msk [vmem:[#allocation2 + $0x78] sm:$0xff] %vm2704_vm12, %v1560_v7  ;;  %vm382_vm12 = vcmp.ne.s32.totalorder %v1684_v35, %v344_v57 }
  0x2b   :  { %1372 = vmatpush3.bf16.xpose.msra.mxu0 %v1419_v18  ;;  %1406 = vmatpush3.bf16.xpose.msra.mxu1 %v1419_v18  ;;  %v338_v18 = vadd.s32 64, %v1682_v34 }
  0x2c   :  { %1373 = vmatprep.subr.bf16.mxu0 %v1420_v23  ;;  %1399 = vmatprep.subr.bf16.mxu1 %v1420_v23 }
  0x33   :  { %1374 = vmatpush3.bf16.xpose.msra.mxu0 %v1420_v23  ;;  %1407 = vmatpush3.bf16.xpose.msra.mxu1 %v1420_v23 }
  0x34   :  { %1375 = vmatprep.subr.bf16.mxu0 %v1421_v26  ;;  %1400 = vmatprep.subr.bf16.mxu1 %v1421_v26 }
  0x3b   :  { %1376 = vmatpush3.bf16.xpose.msra.mxu0 %v1421_v26  ;;  %1408 = vmatpush3.bf16.xpose.msra.mxu1 %v1421_v26 }
  0x42   :  { %1378 = vmatmul.mubr.bf16.vlgmr.msra.gmra.mxu0 %v1424_v27  ;;  %1386 = vmatmul.mubr.bf16.vlgmr.msra.gmra.mxu1 %v1425_v28 }
  0x43   :  { %1381 = vmatprep.mubr.bf16.mxu0 %v1426_v29  ;;  %1389 = vmatprep.mubr.bf16.mxu1 %v1427_v30 }
  0x4a   :  { %1382 = vmatmul.mubr.bf16.gmra.mxu0 %v1428_v31  ;;  %1390 = vmatmul.mubr.bf16.gmra.mxu1 %v1429_v32  ;;  %v339_v31 = vadd.s32 72, %v1682_v34 }
  0x81   :  { %v791_v40 = vpop.permute.xlu1 %790  ;;  %v794_v41 = vpop.permute.xlu0 %793 }
  0x82   :  { %vm841_vm6 = vcmp.eq.s32.totalorder %v791_v40, %v1695_v38  ;;  %vm842_vm7 = vcmp.eq.s32.totalorder %v794_v41, %v1695_v38  ;;  %v336_v41 = vadd.s32 48, %v1682_v34 }
  0x83   :  { %vm1721_vm9 = vmand %vm1700_vm4, %vm841_vm6 }
  0x84   :  { %v985_v47 = vsel %vm1721_vm9, 1.0, %v2710_v46  ;;  %vm1730_vm10 = vmand %vm1706_vm5, %vm842_vm7  ;;  %vm374_vm2 = vcmp.ne.s32.totalorder %v1684_v35, %v336_v41 }
  0x85   :  { %v2739_v48 = vsel %vm1730_vm10, 4294967295, %v2738_v48  ;;  %v797_v49 = vpop.permute.xlu1 %796  ;;  %v1734_v50 = vpop.permute.xlu0 %802  ;;  %1001 = vadd.xlane.f32.xlu0 %v985_v47  ;;  %v986_v51 = vsel %vm1730_vm10, 1.0, %v2710_v46  ;;  %vm1775_vm7 = vmand %vm373_vm3, %vm384_vm1  ;;  %vm378_vm3 = vcmp.ne.s32.totalorder %v1684_v35, %v340_v8  ;;  %v337_v47 = vadd.s32 56, %v1682_v34 }
  0x86   :  { %vm843_vm11 = vcmp.eq.s32.totalorder %v797_v49, %v1695_v38  ;;  %1003 = vadd.xlane.f32.xlu1 %v986_v51  ;;  %v345_v8 = vadd.s32 120, %v1682_v34 }
  0x87   :  { %vm1746_vm14 = vmand %vm1714_vm8, %vm843_vm11 }
  0x88   :  { %v2741_v53 = vsel %vm1746_vm14, 4294967295, %v2740_v53  ;;  %v987_v54 = vsel %vm1746_vm14, 1.0, %v2710_v46 }
  0x89   :  { %v800_v55 = vpop.permute.xlu1 %799  ;;  %v1753_v56 = vpop.permute.xlu0 %808  ;;  %1005 = vadd.xlane.f32.xlu0 %v987_v54 }
  0x8a   :  { %vm844_vm0 = vcmp.eq.s32.totalorder %v800_v55, %v1695_v38 }
  0x8b   :  { %vm1767_vm6 = vmand %vm1757_vm15, %vm844_vm0 }
  0x8c   :  { %v2745_v58 = vsel %vm1767_vm6, 4294967295, %v2744_v58  ;;  %v1782_v62 = vsel %vm1767_vm6, 1.0, %v2710_v46 }
  0x8d   :  { %v806_v59 = vpop.permute.xlu1 %805  ;;  %v1771_v60 = vpop.permute.xlu0 %814 }
  0x8e   :  { %vm846_vm11 = vcmp.eq.s32.totalorder %v806_v59, %v1695_v38 }
  0x8f   :  { %vm1789_vm0 = vmand %vm1775_vm7, %vm846_vm11 }
  0x90   :  { %v2749_v63 = vsel %vm1789_vm0, 4294967295, %v2748_v63  ;;  %v1800_v2 = vsel %vm1789_vm0, 1.0, %v2710_v46  ;;  %vm1938_vm11 = vmand %vm378_vm3, %vm384_vm1  ;;  %vm379_vm3 = vcmp.ne.s32.totalorder %v1684_v35, %v341_v22  ;;  %v969_v22 = vld [vmem:[#allocation5] sm:$0xff] }
  0x91   :  { %v1793_v0 = vpop.permute.xlu1 %811  ;;  %v1795_v1 = vpop.permute.xlu0 %820 }
  0x95   :  { %v1806_v3 = vpop.permute.xlu1 %817  ;;  %v1808_v4 = vpop.permute.xlu0 %826 }
  0x99   :  { %v1814_v5 = vpop.permute.xlu1 %823 }
  0x9d   :  { %v1914_v6 = vpop.permute.xlu1 %829 }
 0x102   :  { %v1379_v9 = vpop.f32.mrf.mxu0  ;;  %v1387_v10 = vpop.f32.mrf.mxu1 }
 0x103   :  { %v314_v11 = vmul.f32 14.285714, %v1379_v9  ;;  %v322_v12 = vmul.f32 14.285714, %v1387_v10  ;;  %v2018_v10 = vpop.permute.xlu0 %832 }
 0x104   :  { %v249_v13 = vpop.f32.mrf.mxu0  ;;  %v281_v14 = vpop.f32.mrf.mxu1 }
 0x105   :  { %v312_v16 = vmul.f32 14.285714, %v249_v13  ;;  %v1944_v17 = vsel %vm1938_vm11, %v322_v12, -1e+30  ;;  %v1950_v20 = vsel %vm1714_vm8, %v314_v11, -1e+30  ;;  %vm376_vm8 = vcmp.ne.s32.totalorder %v1684_v35, %v338_v18 }
 0x106   :  { %455 = vmax.xlane.f32.xlu0 %v1944_v17  ;;  %v1388_v19 = vpop.f32.mrf.mxu1  ;;  %v1380_v21 = vpop.f32.mrf.mxu0  ;;  %439 = vmax.xlane.f32.xlu1 %v1950_v20  ;;  %v320_v26 = vmul.f32 14.285714, %v281_v14  ;;  %v334_v14 = vadd.s32 32, %v1682_v34 }
 0x107   :  { %v315_v23 = vmul.f32 14.285714, %v1380_v21  ;;  %v1956_v27 = vsel %vm1700_vm4, %v312_v16, -1e+30  ;;  %v323_v29 = vmul.f32 14.285714, %v1388_v19  ;;  %vm1969_vm4 = vmand %vm376_vm8, %vm384_vm1  ;;  %vm377_vm8 = vcmp.ne.s32.totalorder %v1684_v35, %v339_v31  ;;  %v2032_v16 = vpop.permute.xlu1 %835 }
 0x108   :  { %v252_v24 = vpop.f32.mrf.mxu0  ;;  %v284_v25 = vpop.f32.mrf.mxu1  ;;  %v1975_v39 = vsel %vm1969_vm4, %v320_v26, -1e+30  ;;  %vm372_vm0 = vcmp.ne.s32.totalorder %v1684_v35, %v334_v14 }
 0x109   :  { %v1960_v28 = vsel %vm1757_vm15, %v315_v23, -1e+30  ;;  %v313_v37 = vmul.f32 14.285714, %v252_v24  ;;  %vm1979_vm15 = vmand %vm379_vm3, %vm384_vm1  ;;  %v321_v43 = vmul.f32 14.285714, %v284_v25 }
 0x10a   :  { %435 = vmax.xlane.f32.xlu0 %v1956_v27  ;;  %v1383_v30 = vpop.f32.mrf.mxu0  ;;  %v1391_v32 = vpop.f32.mrf.mxu1  ;;  %441 = vmax.xlane.f32.xlu1 %v1960_v28  ;;  %v1987_v44 = vsel %vm1979_vm15, %v323_v29, -1e+30  ;;  %vm1994_vm3 = vmand %vm377_vm8, %vm384_vm1  ;;  %vm375_vm8 = vcmp.ne.s32.totalorder %v1684_v35, %v337_v47  ;;  %v970_v24 = vld [vmem:[#allocation5 + $0x8] sm:$0xff]  ;;  %v2764_v29 = vmov 0 }
 0x10b   :  { %v318_v52 = vmul.f32 14.285714, %v1383_v30  ;;  %v2000_v55 = vsel %vm1706_vm5, %v313_v37, -1e+30  ;;  %v2006_v7 = vsel %vm1994_vm3, %v321_v43, -1e+30  ;;  %vm2014_vm5 = vmand %vm374_vm2, %vm384_vm1  ;;  %vm383_vm2 = vcmp.ne.s32.totalorder %v1684_v35, %v345_v8 }
 0x10c   :  { %v265_v33 = vpop.f32.mrf.mxu0  ;;  %v297_v49 = vpop.f32.mrf.mxu1  ;;  %v326_v11 = vmul.f32 14.285714, %v1391_v32  ;;  %vm2026_vm13 = vmand %vm375_vm8, %vm384_vm1  ;;  %v342_v30 = vadd.s32 96, %v1682_v34  ;;  %v343_v37 = vadd.s32 104, %v1682_v34 }
 0x10d   :  { %v2022_v12 = vsel %vm2014_vm5, %v318_v52, -1e+30  ;;  %vm2043_vm8 = vmand %vm382_vm12, %vm384_vm1  ;;  %v316_v25 = vmul.f32 14.285714, %v265_v33 }
 0x10e   :  { %451 = vmax.xlane.f32.xlu0 %v1975_v39  ;;  %457 = vmax.xlane.f32.xlu1 %v1987_v44  ;;  %v1384_v51 = vpop.f32.mrf.mxu0  ;;  %v1392_v9 = vpop.f32.mrf.mxu1  ;;  %v2049_v26 = vsel %vm2043_vm8, %v326_v11, -1e+30  ;;  %vm2053_vm14 = vmand %vm383_vm2, %vm384_vm1  ;;  %vm2768_vm2 = vcmask 7168   ;;  %vm380_vm6 = vcmp.ne.s32.totalorder %v1684_v35, %v342_v30 }
 0x10f   :  { %v319_v59 = vmul.f32 14.285714, %v1384_v51  ;;  %v327_v18 = vmul.f32 14.285714, %v1392_v9  ;;  %v2765_v29 = vsel %vm2053_vm14, 4294967295, %v2764_v29  ;;  %v1002_v31 = vpop.xlane.xlu0 %1001  ;;  %v1004_v43 = vpop.xlane.xlu1 %1003  ;;  %v971_v51 = vld [vmem:[#allocation5 + $0x10] sm:$0xff]  ;;  %vm2068_vm12 = vmand %vm372_vm0, %vm384_vm1  ;;  %vm381_vm0 = vcmp.ne.s32.totalorder %v1684_v35, %v343_v37 }
 0x110   :  { %v268_v21 = vpop.f32.mrf.mxu0  ;;  %v1033_v41 = vadd.f32 %v1002_v31, %v969_v22  ;;  %v300_v47 = vpop.f32.mrf.mxu1  ;;  %v1034_v52 = vadd.f32 %v1004_v43, %v970_v24  ;;  %v2075_v8 = vsel %vm2068_vm12, %v316_v25, -1e+30  ;;  %vm2769_vm10 = vmmov %vm2768_vm2  ;;  %v2109_v22 = vld [vmem:[#allocation2 + $0x50] sm:$0xff] }
 0x111   :  { %v2037_v19 = vsel %vm2026_vm13, %v319_v59, -1e+30  ;;  %v317_v32 = vmul.f32 14.285714, %v268_v21  ;;  %v2062_v33 = vsel %vm2053_vm14, %v327_v18, -1e+30  ;;  %vm2772_vm14 = vmmov %vm2769_vm10 }
 0x112   :  { %437 = vmax.xlane.f32.xlu0 %v2000_v55  ;;  %453 = vmax.xlane.f32.xlu1 %v2006_v7  ;;  %1049 = vst.msk [vmem:[#allocation5] sm:$0xff] %vm2768_vm2, %v1033_v41  ;;  %v324_v59 = vmul.f32 14.285714, %v297_v49  ;;  %v325_v9 = vmul.f32 14.285714, %v300_v47  ;;  %vm2088_vm2 = vmand %vm380_vm6, %vm384_vm1  ;;  %v2111_v24 = vld [vmem:[#allocation2 + $0x10] sm:$0xff] }
 0x113   :  { %v1006_v34 = vpop.xlane.xlu0 %1005  ;;  %1050 = vst.msk [vmem:[#allocation5 + $0x8] sm:$0xff] %vm2769_vm10, %v1034_v52  ;;  %v2082_v11 = vsel %vm1775_vm7, %v317_v32, -1e+30  ;;  %vm2099_vm10 = vmand %vm381_vm0, %vm384_vm1  ;;  %v2119_v32 = vld [vmem:[#allocation2] sm:$0xff]  ;;  %v2125_v41 = vld [vmem:[#allocation2 + $0x18] sm:$0xff] }
 0x114   :  { %v1035_v14 = vadd.f32 %v1006_v34, %v971_v51  ;;  %v2095_v18 = vsel %vm2088_vm2, %v324_v59, -1e+30  ;;  %v2106_v21 = vsel %vm2099_vm10, %v325_v9, -1e+30  ;;  %vm2776_vm1 = vmmov %vm2772_vm14  ;;  %2777 = vst [vmem:[#allocation7_spill] sm:$0xff] %v2125_v41  ;;  %v2138_v34 = vld [vmem:[#allocation2 + $0x40] sm:$0xff] }
 0x115   :  { %2780 = vst [vmem:[#allocation9_spill] sm:$0xff] %v2138_v34  ;;  %vm2781_vm6 = vmmov %vm2776_vm1  ;;  %v2158_v9 = vld [vmem:[#allocation2 + $0x8] sm:$0xff] }
 0x116   :  { %447 = vmax.xlane.f32.xlu0 %v2022_v12  ;;  %449 = vmax.xlane.f32.xlu1 %v2037_v19  ;;  %1051 = vst.msk [vmem:[#allocation5 + $0x10] sm:$0xff] %vm2772_vm14, %v1035_v14  ;;  %vm2778_vm14 = vmmov %vm2776_vm1  ;;  %v2145_v14 = vld [vmem:[#allocation2 + $0x58] sm:$0xff] }
 0x117   :  { %2782 = vst [vmem:[#allocation10_spill] sm:$0xff] %v2145_v14  ;;  %vm2783_vm7 = vmmov %vm2776_vm1 }
 0x118   :  { %2786 = vst [vmem:[#allocation13_spill] sm:$0xff] %v2158_v9  ;;  %vm2787_vm0 = vmmov %vm2776_vm1 }
 0x11a   :  { %463 = vmax.xlane.f32.xlu0 %v2049_v26  ;;  %465 = vmax.xlane.f32.xlu1 %v2062_v33 }
 0x11e   :  { %443 = vmax.xlane.f32.xlu0 %v2075_v8  ;;  %445 = vmax.xlane.f32.xlu1 %v2082_v11 }
 0x122   :  { %459 = vmax.xlane.f32.xlu0 %v2095_v18  ;;  %461 = vmax.xlane.f32.xlu1 %v2106_v21 }
 0x18f   :  { %v456_v25 = vpop.xlane.xlu0 %455  ;;  %v440_v35 = vpop.xlane.xlu1 %439 }
 0x190   :  { %v2114_v30 = vmax.f32 %v2109_v22, %v456_v25  ;;  %v2117_v31 = vmax.f32 %v2111_v24, %v440_v35  ;;  %v2164_v25 = vld [vmem:[#allocation2 + $0x48] sm:$0xff] }
 0x191   :  { %2788 = vst [vmem:[#allocation14_spill] sm:$0xff] %v2164_v25 }
 0x192   :  { %2775 = vst [vmem:[#allocation6_spill] sm:$0xff] %v2114_v30  ;;  %766 = vst.msk [vmem:[#allocation2 + $0x50] sm:$0xff] %vm2776_vm1, %v2114_v30  ;;  %495 = vperm.xlu1 %1412, %v2117_v31  }
 0x193   :  { %758 = vst.msk [vmem:[#allocation2 + $0x10] sm:$0xff] %vm2778_vm14, %v2117_v31  ;;  %v436_v47 = vpop.xlane.xlu0 %435  ;;  %v442_v52 = vpop.xlane.xlu1 %441  ;;  %vm2789_vm1 = vmmov %vm2787_vm0 }
 0x194   :  { %v2133_v51 = vmax.f32 %v2119_v32, %v436_v47  ;;  %v2136_v59 = vmax.f32 %v2125_v41, %v442_v52  ;;  %vm2793_vm14 = vmmov %vm2787_vm0 }
 0x196   :  { %2779 = vst [vmem:[#allocation8_spill] sm:$0xff] %v2136_v59  ;;  %756 = vst.msk [vmem:[#allocation2] sm:$0xff] %vm2781_vm6, %v2133_v51  ;;  %485 = vperm.xlu0 %1413, %v2133_v51   ;;  %535 = vperm.xlu1 %1412, %v2114_v30  }
 0x197   :  { %759 = vst.msk [vmem:[#allocation2 + $0x18] sm:$0xff] %vm2783_vm7, %v2136_v59  ;;  %v452_v35 = vpop.xlane.xlu0 %451  ;;  %v458_v52 = vpop.xlane.xlu1 %457  ;;  %vm2795_vm6 = vmmov %vm2787_vm0 }
 0x198   :  { %v2153_v47 = vmax.f32 %v2138_v34, %v452_v35  ;;  %v2156_v37 = vmax.f32 %v2145_v14, %v458_v52  ;;  %v2178_v34 = vld [vmem:[#allocation2 + $0x30] sm:$0xff]  ;;  %v2184_v14 = vld [vmem:[#allocation2 + $0x38] sm:$0xff]  ;;  %vm2798_vm7 = vmmov %vm2787_vm0 }
 0x199   :  { %2792 = vst [vmem:[#allocation17_spill] sm:$0xff] %v2178_v34  ;;  %2794 = vst [vmem:[#allocation18_spill] sm:$0xff] %v2184_v14 }
 0x19a   :  { %2784 = vst [vmem:[#allocation11_spill] sm:$0xff] %v2153_v47  ;;  %2785 = vst [vmem:[#allocation12_spill] sm:$0xff] %v2156_v37  ;;  %540 = vperm.xlu0 %1413, %v2156_v37   ;;  %525 = vperm.xlu1 %1412, %v2153_v47  }
 0x19b   :  { %764 = vst.msk [vmem:[#allocation2 + $0x40] sm:$0xff] %vm2787_vm0, %v2153_v47  ;;  %v438_v35 = vpop.xlane.xlu0 %437  ;;  %v454_v52 = vpop.xlane.xlu1 %453  ;;  %v2198_v47 = vld [vmem:[#allocation2 + $0x70] sm:$0xff] }
 0x19c   :  { %767 = vst.msk [vmem:[#allocation2 + $0x58] sm:$0xff] %vm2789_vm1, %v2156_v37  ;;  %v2173_v41 = vmax.f32 %v2158_v9, %v438_v35  ;;  %v2176_v43 = vmax.f32 %v2164_v25, %v454_v52  ;;  %2797 = vst [vmem:[#allocation20_spill] sm:$0xff] %v2198_v47  ;;  %v2204_v25 = vld [vmem:[#allocation2 + $0x78] sm:$0xff] }
 0x19d   :  { %2799 = vst [vmem:[#allocation21_spill] sm:$0xff] %v2204_v25  ;;  %vm2802_vm1 = vmmov %vm2787_vm0 }
 0x19e   :  { %2790 = vst [vmem:[#allocation15_spill] sm:$0xff] %v2173_v41  ;;  %2791 = vst [vmem:[#allocation16_spill] sm:$0xff] %v2176_v43  ;;  %530 = vperm.xlu0 %1413, %v2176_v43   ;;  %500 = vperm.xlu1 %1412, %v2136_v59  }
 0x19f   :  { %757 = vst.msk [vmem:[#allocation2 + $0x8] sm:$0xff] %vm2793_vm14, %v2173_v41  ;;  %v448_v35 = vpop.xlane.xlu0 %447  ;;  %v450_v46 = vpop.xlane.xlu1 %449  ;;  %vm2803_vm14 = vmmov %vm2787_vm0 }
 0x1a0   :  { %765 = vst.msk [vmem:[#allocation2 + $0x48] sm:$0xff] %vm2795_vm6, %v2176_v43  ;;  %v2193_v52 = vmax.f32 %v2178_v34, %v448_v35  ;;  %v2196_v9 = vmax.f32 %v2184_v14, %v450_v46  ;;  %v2217_v34 = vld [vmem:[#allocation2 + $0x20] sm:$0xff]  ;;  %v2223_v43 = vld [vmem:[#allocation2 + $0x28] sm:$0xff]  ;;  %vm2804_vm6 = vmmov %vm2787_vm0 }
 0x1a1   :  { %2801 = vst [vmem:[#allocation23_spill] sm:$0xff] %v2217_v34 }
 0x1a2   :  { %2796 = vst [vmem:[#allocation19_spill] sm:$0xff] %v2193_v52  ;;  %762 = vst.msk [vmem:[#allocation2 + $0x30] sm:$0xff] %vm2798_vm7, %v2193_v52  ;;  %490 = vperm.xlu1 %1412, %v2173_v41   ;;  %v2237_v41 = vld [vmem:[#allocation2 + $0x60] sm:$0xff] }
 0x1a3   :  { %763 = vst.msk [vmem:[#allocation2 + $0x38] sm:$0xff] %vm2787_vm0, %v2196_v9  ;;  %v464_v46 = vpop.xlane.xlu0 %463  ;;  %v466_v59 = vpop.xlane.xlu1 %465  ;;  %vm2805_vm7 = vmmov %vm2787_vm0 }
 0x1a4   :  { %v2212_v35 = vmax.f32 %v2198_v47, %v464_v46  ;;  %v2215_v37 = vmax.f32 %v2204_v25, %v466_v59  ;;  %v2243_v25 = vld [vmem:[#allocation2 + $0x68] sm:$0xff] }
 0x1a6   :  { %2800 = vst [vmem:[#allocation22_spill] sm:$0xff] %v2215_v37  ;;  %770 = vst.msk [vmem:[#allocation2 + $0x70] sm:$0xff] %vm2802_vm1, %v2212_v35  ;;  %560 = vperm.xlu0 %1413, %v2215_v37   ;;  %515 = vperm.xlu1 %1412, %v2193_v52  }
 0x1a7   :  { %771 = vst.msk [vmem:[#allocation2 + $0x78] sm:$0xff] %vm2803_vm14, %v2215_v37  ;;  %v444_v59 = vpop.xlane.xlu0 %443  ;;  %v446_v30 = vpop.xlane.xlu1 %445  ;;  %vm2806_vm1 = vmmov %vm2787_vm0  ;;  %vm2807_vm14 = vcmp.eq.s32.totalorder %v1734_v50, %v1695_v38 }
 0x1a8   :  { %v2232_v46 = vmax.f32 %v2217_v34, %v444_v59  ;;  %v2235_v47 = vmax.f32 %v2223_v43, %v446_v30 }
 0x1aa   :  { %760 = vst.msk [vmem:[#allocation2 + $0x20] sm:$0xff] %vm2804_vm6, %v2232_v46  ;;  %555 = vperm.xlu1 %1412, %v2212_v35   ;;  %vm2271_vm6 = vmand %vm2068_vm12, %vm2807_vm14  ;;  %vm2814_vm12 = vcmp.eq.s32.totalorder %v1771_v60, %v1695_v38 }
 0x1ab   :  { %761 = vst.msk [vmem:[#allocation2 + $0x28] sm:$0xff] %vm2805_vm7, %v2235_v47  ;;  %v460_v30 = vpop.xlane.xlu0 %459  ;;  %v462_v52 = vpop.xlane.xlu1 %461  ;;  %vm2811_vm7 = vcmp.eq.s32.totalorder %v1753_v56, %v1695_v38 }
 0x1ac   :  { %v2251_v59 = vmax.f32 %v2237_v41, %v460_v30  ;;  %v2254_v14 = vmax.f32 %v2243_v25, %v462_v52  ;;  %v2810_v30 = vmov 0.0  }
 0x1ad   :  { %v989_v37 = vsel %vm2271_vm6, 1.0, %v2810_v30 }
 0x1ae   :  { %768 = vst.msk [vmem:[#allocation2 + $0x60] sm:$0xff] %vm2787_vm0, %v2251_v59  ;;  %505 = vperm.xlu1 %1412, %v2232_v46   ;;  %vm2283_vm0 = vmand %vm2014_vm5, %vm2811_vm7  ;;  %vm2817_vm5 = vcmp.eq.s32.totalorder %v1795_v1, %v1695_v38 }
 0x1af   :  { %769 = vst.msk [vmem:[#allocation2 + $0x68] sm:$0xff] %vm2806_vm1, %v2254_v14  ;;  %v991_v50 = vsel %vm2283_vm0, 1.0, %v2810_v30  ;;  %vm2295_vm1 = vmand %vm1969_vm4, %vm2814_vm12  ;;  %vm2820_vm4 = vcmp.eq.s32.totalorder %v1808_v4, %v1695_v38 }
 0x1b0   :  { %v993_v56 = vsel %vm2295_vm1, 1.0, %v2810_v30  ;;  %vm2307_vm14 = vmand %vm1938_vm11, %vm2817_vm5  ;;  %vm855_vm11 = vcmp.eq.s32.totalorder %v2018_v10, %v1695_v38  ;;  %v889_v10 = vsel %vm1721_vm9, %v1956_v27, 0.0  ;;  %vm2828_vm9 = vcmp.eq.s32.totalorder %v1806_v3, %v1695_v38 }
 0x1b1   :  { %v995_v60 = vsel %vm2307_vm14, 1.0, %v2810_v30  ;;  %vm2319_vm7 = vmand %vm2088_vm2, %vm2820_vm4 }
 0x1b2   :  { %545 = vperm.xlu1 %1412, %v2251_v59   ;;  %v997_v1 = vsel %vm2319_vm7, 1.0, %v2810_v30  ;;  %vm2330_vm12 = vmand %vm2043_vm8, %vm855_vm11  ;;  %vm2825_vm8 = vcmp.eq.s32.totalorder %v1793_v0, %v1695_v38  ;;  %v981_v0 = vld [vmem:[#allocation5 + $0x60] sm:$0xff]  ;;  %v901_v34 = vsel %vm2319_vm7, %v2095_v18, 0.0 }
 0x1b3   :  { %v999_v4 = vsel %vm2330_vm12, 1.0, %v2810_v30  ;;  %vm2347_vm2 = vmand %vm2026_vm13, %vm2825_vm8  ;;  %vm2831_vm13 = vcmp.eq.s32.totalorder %v1814_v5, %v1695_v38  ;;  %vm2837_vm8 = vnez %v2765_v29 }
 0x1b4   :  { %v992_v49 = vsel %vm2347_vm2, 1.0, %v2810_v30  ;;  %vm2359_vm5 = vmand %vm1994_vm3, %vm2828_vm9  ;;  %vm2834_vm3 = vcmp.eq.s32.totalorder %v1914_v6, %v1695_v38 }
 0x1b5   :  { %vm2371_vm4 = vmand %vm1979_vm15, %vm2831_vm13  ;;  %vm856_vm15 = vcmp.eq.s32.totalorder %v2032_v16, %v1695_v38  ;;  %vm2841_vm13 = vnez %v2745_v58 }
 0x1b6   :  { %520 = vperm.xlu1 %1412, %v2196_v9   ;;  %vm2383_vm11 = vmand %vm2099_vm10, %vm2834_vm3  ;;  %vm2840_vm10 = vnez %v2739_v48  ;;  %v892_v54 = vsel %vm2841_vm13, %v1960_v28, 0.0  ;;  %vm2842_vm3 = vnez %v2749_v63 }
 0x1b7   :  { %v998_v5 = vsel %vm2383_vm11, 1.0, %v2810_v30  ;;  %vm2394_vm9 = vmand %vm2837_vm8, %vm856_vm15  ;;  %v890_v38 = vsel %vm2840_vm10, %v2000_v55, 0.0  ;;  %v894_v13 = vsel %vm2842_vm3, %v2082_v11, 0.0  ;;  %vm2843_vm15 = vnez %v2741_v53 }
 0x1b8   :  { %v1000_v6 = vsel %vm2394_vm9, 1.0, %v2810_v30 }
 0x1ba   :  { %510 = vperm.xlu1 %1412, %v2235_v47  }
 0x1c5   :  { %1009 = vadd.xlane.f32.xlu0 %v989_v37 }
 0x1c9   :  { %1013 = vadd.xlane.f32.xlu0 %v991_v50  ;;  %v891_v50 = vsel %vm2843_vm15, %v1950_v20, 0.0 }
 0x1cd   :  { %1017 = vadd.xlane.f32.xlu0 %v993_v56 }
 0x1d1   :  { %1021 = vadd.xlane.f32.xlu0 %v995_v60 }
 0x1d5   :  { %1025 = vadd.xlane.f32.xlu0 %v997_v1 }
 0x1d9   :  { %1029 = vadd.xlane.f32.xlu0 %v999_v4  ;;  %v893_v4 = vsel %vm2271_vm6, %v2075_v8, 0.0  ;;  %vm2844_vm6 = vcmask 7168  }
 0x1dd   :  { %905 = vadd.xlane.f32.xlu0 %v889_v10 }
 0x1de   :  { %1007 = vadd.xlane.f32.xlu1 %v1782_v62  ;;  %v994_v62 = vsel %vm2359_vm5, 1.0, %v2810_v30 }
 0x1e2   :  { %1011 = vadd.xlane.f32.xlu1 %v1800_v2  ;;  %v996_v2 = vsel %vm2371_vm4, 1.0, %v2810_v30 }
 0x1e6   :  { %1015 = vadd.xlane.f32.xlu1 %v992_v49 }
 0x1ea   :  { %1019 = vadd.xlane.f32.xlu1 %v994_v62 }
 0x1ee   :  { %1023 = vadd.xlane.f32.xlu1 %v996_v2 }
 0x1f2   :  { %1027 = vadd.xlane.f32.xlu1 %v998_v5 }
 0x1f3   :  { %550 = vperm.xlu0 %1413, %v2254_v14  }
 0x1f6   :  { %1031 = vadd.xlane.f32.xlu1 %v1000_v6 }
 0x1fa   :  { %907 = vadd.xlane.f32.xlu1 %v890_v38 }
 0x1fe   :  { %911 = vadd.xlane.f32.xlu1 %v892_v54 }
 0x202   :  { %915 = vadd.xlane.f32.xlu1 %v894_v13 }
 0x20d   :  { %v496_v16 = vpop.permute.xlu1 %495 }
 0x20e   :  { %v565_v29 = vsub.f32 %v1950_v20, %v496_v16 }
 0x210   :  { %v583_v61 = vmul.f32 1.442695, %v565_v29 }
 0x211   :  { %v486_v37 = vpop.permute.xlu0 %485  ;;  %v536_v48 = vpop.permute.xlu1 %535 }
 0x212   :  { %v563_v30 = vsub.f32 %v1956_v27, %v486_v37  ;;  %1430 = vpow2.f32 %v583_v61  ;;  %v573_v58 = vsub.f32 %v1944_v17, %v536_v48  ;;  %909 = vadd.xlane.f32.xlu0 %v891_v50 }
 0x214   :  { %v579_v56 = vmul.f32 1.442695, %v563_v30  ;;  %v599_v63 = vmul.f32 1.442695, %v573_v58 }
 0x215   :  { %v541_v60 = vpop.permute.xlu0 %540  ;;  %v526_v1 = vpop.permute.xlu1 %525 }
 0x216   :  { %1432 = vpow2.f32 %v579_v56  ;;  %v571_v27 = vsub.f32 %v1975_v39, %v526_v1  ;;  %913 = vadd.xlane.f32.xlu0 %v893_v4  ;;  %v574_v49 = vsub.f32 %v1987_v44, %v541_v60 }
 0x217   :  { %1434 = vpow2.f32 %v599_v63 }
 0x218   :  { %v595_v10 = vmul.f32 1.442695, %v571_v27  ;;  %v601_v54 = vmul.f32 1.442695, %v574_v49 }
 0x219   :  { %v501_v53 = vpop.permute.xlu1 %500  ;;  %v531_v62 = vpop.permute.xlu0 %530 }
 0x21a   :  { %v566_v20 = vsub.f32 %v1960_v28, %v501_v53  ;;  %1436 = vpow2.f32 %v595_v10  ;;  %v572_v6 = vsub.f32 %v2006_v7, %v531_v62 }
 0x21c   :  { %v585_v2 = vmul.f32 1.442695, %v566_v20  ;;  %v597_v61 = vmul.f32 1.442695, %v572_v6 }
 0x21d   :  { %v491_v5 = vpop.permute.xlu1 %490 }
 0x21e   :  { %v564_v38 = vsub.f32 %v2000_v55, %v491_v5  ;;  %1438 = vpow2.f32 %v585_v2 }
 0x21f   :  { %v1431_v52 = vpop.eup %1430 }
 0x220   :  { %v581_v13 = vmul.f32 1.442695, %v564_v38  ;;  %615 = vadd.xlane.f32.xlu0 %v1431_v52 }
 0x221   :  { %v516_v16 = vpop.permute.xlu1 %515  ;;  %v561_v63 = vpop.permute.xlu0 %560 }
 0x222   :  { %1440 = vpow2.f32 %v581_v13  ;;  %v569_v28 = vsub.f32 %v2022_v12, %v516_v16  ;;  %v578_v27 = vsub.f32 %v2062_v33, %v561_v63  ;;  %v975_v63 = vld [vmem:[#allocation5 + $0x30] sm:$0xff] }
 0x223   :  { %v1433_v29 = vpop.eup %1432  ;;  %1442 = vpow2.f32 %v601_v54 }
 0x224   :  { %v1435_v37 = vpop.eup %1434  ;;  %611 = vadd.xlane.f32.xlu1 %v1433_v29  ;;  %v591_v30 = vmul.f32 1.442695, %v569_v28  ;;  %1444 = vpow2.f32 %v597_v61  ;;  %v609_v2 = vmul.f32 1.442695, %v578_v27 }
 0x225   :  { %631 = vadd.xlane.f32.xlu0 %v1435_v37  ;;  %v556_v48 = vpop.permute.xlu1 %555 }
 0x226   :  { %v577_v55 = vsub.f32 %v2049_v26, %v556_v48  ;;  %1446 = vpow2.f32 %v591_v30 }
 0x227   :  { %v1437_v50 = vpop.eup %1436 }
 0x228   :  { %v607_v58 = vmul.f32 1.442695, %v577_v55  ;;  %v896_v55 = vsel %vm2347_vm2, %v2037_v19, 0.0  ;;  %vm2845_vm2 = vmmov %vm2844_vm6 }
 0x229   :  { %627 = vadd.xlane.f32.xlu0 %v1437_v50  ;;  %v506_v56 = vpop.permute.xlu1 %505  ;;  %vm2848_vm8 = vmmov %vm2845_vm2 }
 0x22a   :  { %1448 = vpow2.f32 %v607_v58  ;;  %v567_v60 = vsub.f32 %v2075_v8, %v506_v56  ;;  %v898_v56 = vsel %vm2359_vm5, %v2006_v7, 0.0  ;;  %v902_v7 = vsel %vm2383_vm11, %v2106_v21, 0.0  ;;  %vm2846_vm5 = vmmov %vm2845_vm2 }
 0x22b   :  { %v1439_v1 = vpop.eup %1438  ;;  %vm2849_vm11 = vmmov %vm2845_vm2 }
 0x22c   :  { %v587_v4 = vmul.f32 1.442695, %v567_v60  ;;  %617 = vadd.xlane.f32.xlu1 %v1439_v1  ;;  %vm2851_vm10 = vmmov %vm2845_vm2 }
 0x22d   :  { %v546_v10 = vpop.permute.xlu1 %545  ;;  %vm2852_vm13 = vmmov %vm2845_vm2 }
 0x22e   :  { %1450 = vpow2.f32 %v587_v4  ;;  %v575_v53 = vsub.f32 %v2095_v18, %v546_v10  ;;  %v900_v4 = vsel %vm2371_vm4, %v1987_v44, 0.0  ;;  %v904_v44 = vsel %vm2394_vm9, %v2062_v33, 0.0  ;;  %vm2847_vm4 = vmmov %vm2845_vm2  ;;  %v974_v33 = vld [vmem:[#allocation5 + $0x28] sm:$0xff]  ;;  %v875_v18 = vld [vmem:[#allocation4 + $0x10] sm:$0xff] }
 0x22f   :  { %v1441_v20 = vpop.eup %1440  ;;  %vm2850_vm9 = vmmov %vm2845_vm2 }
 0x230   :  { %v1443_v49 = vpop.eup %1442  ;;  %v603_v62 = vmul.f32 1.442695, %v575_v53  ;;  %613 = vadd.xlane.f32.xlu0 %v1441_v20  ;;  %vm2853_vm3 = vmmov %vm2845_vm2 }
 0x231   :  { %633 = vadd.xlane.f32.xlu1 %v1443_v49  ;;  %v521_v5 = vpop.permute.xlu1 %520  ;;  %v1445_v8 = vpop.eup %1444  ;;  %vm2854_vm15 = vmmov %vm2845_vm2 }
 0x232   :  { %1452 = vpow2.f32 %v603_v62  ;;  %v570_v6 = vsub.f32 %v2037_v19, %v521_v5  ;;  %v977_v19 = vld [vmem:[#allocation5 + $0x40] sm:$0xff]  ;;  %v983_v62 = vld [vmem:[#allocation5 + $0x70] sm:$0xff] }
 0x233   :  { %v1447_v38 = vpop.eup %1446  ;;  %1454 = vpow2.f32 %v609_v2  ;;  %v873_v5 = vld [vmem:[#allocation4] sm:$0xff] }
 0x234   :  { %v593_v52 = vmul.f32 1.442695, %v570_v6  ;;  %623 = vadd.xlane.f32.xlu0 %v1447_v38  ;;  %v972_v6 = vld [vmem:[#allocation5 + $0x18] sm:$0xff] }
 0x235   :  { %629 = vadd.xlane.f32.xlu1 %v1445_v8  ;;  %v511_v54 = vpop.permute.xlu1 %510 }
 0x236   :  { %1456 = vpow2.f32 %v593_v52  ;;  %v568_v13 = vsub.f32 %v2082_v11, %v511_v54  ;;  %v973_v11 = vld [vmem:[#allocation5 + $0x20] sm:$0xff] }
 0x237   :  { %v1449_v16 = vpop.eup %1448 }
 0x238   :  { %v589_v29 = vmul.f32 1.442695, %v568_v13 }
 0x239   :  { %639 = vadd.xlane.f32.xlu1 %v1449_v16  ;;  %v976_v16 = vld [vmem:[#allocation5 + $0x38] sm:$0xff] }
 0x23a   :  { %1458 = vpow2.f32 %v589_v29 }
 0x23b   :  { %v1451_v61 = vpop.eup %1450 }
 0x23c   :  { %619 = vadd.xlane.f32.xlu0 %v1451_v61 }
 0x23f   :  { %v1453_v28 = vpop.eup %1452 }
 0x240   :  { %635 = vadd.xlane.f32.xlu0 %v1453_v28  ;;  %v1455_v37 = vpop.eup %1454 }
 0x243   :  { %v1457_v30 = vpop.eup %1456 }
 0x244   :  { %641 = vadd.xlane.f32.xlu0 %v1455_v37  ;;  %625 = vadd.xlane.f32.xlu1 %v1457_v30 }
 0x247   :  { %v1459_v48 = vpop.eup %1458 }
 0x248   :  { %621 = vadd.xlane.f32.xlu1 %v1459_v48  ;;  %v978_v48 = vld [vmem:[#allocation5 + $0x48] sm:$0xff] }
 0x24c   :  { %919 = vadd.xlane.f32.xlu1 %v896_v55 }
 0x24e   :  { %v1010_v50 = vpop.xlane.xlu0 %1009 }
 0x24f   :  { %v1037_v58 = vadd.f32 %v1010_v50, %v973_v11  ;;  %v980_v50 = vld [vmem:[#allocation5 + $0x58] sm:$0xff] }
 0x250   :  { %923 = vadd.xlane.f32.xlu1 %v898_v56 }
 0x251   :  { %1053 = vst.msk [vmem:[#allocation5 + $0x20] sm:$0xff] %vm2844_vm6, %v1037_v58  ;;  %vm2855_vm6 = vmmov %vm2845_vm2 }
 0x252   :  { %v1014_v60 = vpop.xlane.xlu0 %1013 }
 0x253   :  { %v1039_v1 = vadd.f32 %v1014_v60, %v975_v63  ;;  %v982_v63 = vld [vmem:[#allocation5 + $0x68] sm:$0xff] }
 0x254   :  { %927 = vadd.xlane.f32.xlu1 %v900_v4 }
 0x255   :  { %1055 = vst.msk [vmem:[#allocation5 + $0x30] sm:$0xff] %vm2845_vm2, %v1039_v1 }
 0x256   :  { %v1018_v23 = vpop.xlane.xlu0 %1017 }
 0x257   :  { %v1041_v27 = vadd.f32 %v1018_v23, %v977_v19 }
 0x258   :  { %931 = vadd.xlane.f32.xlu1 %v902_v7 }
 0x259   :  { %1057 = vst.msk [vmem:[#allocation5 + $0x40] sm:$0xff] %vm2846_vm5, %v1041_v27  ;;  %v874_v27 = vld [vmem:[#allocation4 + $0x8] sm:$0xff]  ;;  %vm2856_vm5 = vmmov %vm2845_vm2 }
 0x25a   :  { %v1022_v10 = vpop.xlane.xlu0 %1021 }
 0x25b   :  { %v1043_v53 = vadd.f32 %v1022_v10, %v979_v45  ;;  %v895_v10 = vsel %vm2283_vm0, %v2022_v12, 0.0  ;;  %v899_v12 = vsel %vm2307_vm14, %v1944_v17, 0.0  ;;  %vm2859_vm0 = vmmov %vm2845_vm2  ;;  %v2861_v17 = vsub.f32 %v2119_v32, %v2133_v51  ;;  %v2868_v51 = vld [vmem:[#allocation7_spill] sm:$0xff] }
 0x25c   :  { %935 = vadd.xlane.f32.xlu1 %v904_v44  ;;  %vm2871_vm14 = vmmov %vm2859_vm0 }
 0x25d   :  { %1059 = vst.msk [vmem:[#allocation5 + $0x50] sm:$0xff] %vm2847_vm4, %v1043_v53  ;;  %v876_v53 = vld [vmem:[#allocation4 + $0x18] sm:$0xff]  ;;  %vm2857_vm4 = vmmov %vm2845_vm2  ;;  %v675_v42 = vmul.f32 1.442695, %v2861_v17  ;;  %v2887_v17 = vld [vmem:[#allocation23_spill] sm:$0xff] }
 0x25e   :  { %v1026_v20 = vpop.xlane.xlu0 %1025  ;;  %vm2884_vm7 = vmmov %vm2859_vm0 }
 0x25f   :  { %v1045_v49 = vadd.f32 %v1026_v20, %v981_v0  ;;  %v897_v20 = vsel %vm2295_vm1, %v1975_v39, 0.0  ;;  %v2860_v39 = vsub.f32 %v2111_v24, %v2117_v31  ;;  %v2864_v31 = vld [vmem:[#allocation9_spill] sm:$0xff]  ;;  %vm2867_vm1 = vmmov %vm2859_vm0 }
 0x261   :  { %1061 = vst.msk [vmem:[#allocation5 + $0x60] sm:$0xff] %vm2848_vm8, %v1045_v49  ;;  %v878_v49 = vld [vmem:[#allocation4 + $0x28] sm:$0xff]  ;;  %vm2858_vm8 = vmmov %vm2845_vm2  ;;  %v679_v57 = vmul.f32 1.442695, %v2860_v39 }
 0x262   :  { %v1030_v3 = vpop.xlane.xlu0 %1029 }
 0x263   :  { %v1047_v2 = vadd.f32 %v1030_v3, %v983_v62 }
 0x265   :  { %1063 = vst.msk [vmem:[#allocation5 + $0x70] sm:$0xff] %vm2849_vm11, %v1047_v2  ;;  %v903_v2 = vsel %vm2330_vm12, %v2049_v26, 0.0  ;;  %v877_v26 = vld [vmem:[#allocation4 + $0x20] sm:$0xff]  ;;  %vm2889_vm12 = vmmov %vm2859_vm0 }
 0x266   :  { %v906_v8 = vpop.xlane.xlu0 %905  ;;  %vm2890_vm11 = vmmov %vm2859_vm0 }
 0x267   :  { %v937_v38 = vadd.f32 %v906_v8, %v873_v5  ;;  %v1008_v52 = vpop.xlane.xlu1 %1007  ;;  %v2862_v5 = vld [vmem:[#allocation6_spill] sm:$0xff] }
 0x268   :  { %v1036_v40 = vadd.f32 %v1008_v52, %v972_v6  ;;  %v2863_v6 = vsub.f32 %v2109_v22, %v2862_v5 }
 0x269   :  { %953 = vst.msk [vmem:[#allocation4] sm:$0xff] %vm2850_vm9, %v937_v38  ;;  %v2865_v38 = vld [vmem:[#allocation11_spill] sm:$0xff]  ;;  %vm2892_vm9 = vmmov %vm2859_vm0 }
 0x26a   :  { %1052 = vst.msk [vmem:[#allocation5 + $0x18] sm:$0xff] %vm2851_vm10, %v1036_v40  ;;  %v695_v8 = vmul.f32 1.442695, %v2863_v6  ;;  %v2866_v52 = vsub.f32 %v2864_v31, %v2865_v38  ;;  %v2891_v38 = vsub.f32 %v2237_v41, %v2251_v59  ;;  %v2528_v41 = vld [vmem:[#allocation5] sm:$0xff]  ;;  %v2895_v59 = vld [vmem:[#allocation21_spill] sm:$0xff]  ;;  %vm2898_vm10 = vmmov %vm2859_vm0 }
 0x26b   :  { %v1012_v54 = vpop.xlane.xlu1 %1011 }
 0x26c   :  { %v1038_v13 = vadd.f32 %v1012_v54, %v974_v33  ;;  %v691_v15 = vmul.f32 1.442695, %v2866_v52  ;;  %v2869_v33 = vld [vmem:[#allocation8_spill] sm:$0xff]  ;;  %v699_v52 = vmul.f32 1.442695, %v2891_v38 }
 0x26d   :  { %v2870_v54 = vsub.f32 %v2868_v51, %v2869_v33 }
 0x26e   :  { %1054 = vst.msk [vmem:[#allocation5 + $0x28] sm:$0xff] %vm2852_vm13, %v1038_v13  ;;  %v551_v29 = vpop.permute.xlu0 %550  ;;  %v2872_v13 = vld [vmem:[#allocation13_spill] sm:$0xff]  ;;  %vm2900_vm13 = vmmov %vm2859_vm0 }
 0x26f   :  { %v576_v61 = vsub.f32 %v2106_v21, %v551_v29  ;;  %v1016_v28 = vpop.xlane.xlu1 %1015  ;;  %v984_v21 = vld [vmem:[#allocation5 + $0x78] sm:$0xff]  ;;  %v681_v22 = vmul.f32 1.442695, %v2870_v54 }
 0x270   :  { %v1040_v37 = vadd.f32 %v1016_v28, %v976_v16  ;;  %v2873_v16 = vld [vmem:[#allocation15_spill] sm:$0xff]  ;;  %v654_v54 = vld [vmem:[#allocation3 + $0x58] sm:$0xff] }
 0x271   :  { %v605_v30 = vmul.f32 1.442695, %v576_v61  ;;  %v2874_v29 = vsub.f32 %v2872_v13, %v2873_v16 }
 0x272   :  { %1056 = vst.msk [vmem:[#allocation5 + $0x38] sm:$0xff] %vm2853_vm3, %v1040_v37  ;;  %v2875_v37 = vld [vmem:[#allocation10_spill] sm:$0xff]  ;;  %vm2901_vm3 = vmmov %vm2859_vm0 }
 0x273   :  { %1460 = vpow2.f32 %v605_v30  ;;  %v1020_v55 = vpop.xlane.xlu1 %1019  ;;  %v677_v61 = vmul.f32 1.442695, %v2874_v29  ;;  %v2876_v30 = vld [vmem:[#allocation12_spill] sm:$0xff] }
 0x274   :  { %v1042_v11 = vadd.f32 %v1020_v55, %v978_v48  ;;  %1462 = vpow2.f32 %v679_v57  ;;  %v2877_v48 = vsub.f32 %v2875_v37, %v2876_v30 }
 0x275   :  { %1464 = vpow2.f32 %v675_v42  ;;  %v2888_v42 = vsub.f32 %v2887_v17, %v2232_v46 }
 0x276   :  { %1058 = vst.msk [vmem:[#allocation5 + $0x48] sm:$0xff] %vm2854_vm15, %v1042_v11  ;;  %1466 = vpow2.f32 %v695_v8  ;;  %v697_v55 = vmul.f32 1.442695, %v2877_v48  ;;  %v645_v11 = vld [vmem:[#allocation3 + $0x10] sm:$0xff]  ;;  %vm2902_vm15 = vmmov %vm2859_vm0 }
 0x277   :  { %v1024_v58 = vpop.xlane.xlu1 %1023  ;;  %1468 = vpow2.f32 %v691_v15  ;;  %v683_v5 = vmul.f32 1.442695, %v2888_v42 }
 0x278   :  { %v1044_v56 = vadd.f32 %v1024_v58, %v980_v50  ;;  %1470 = vpow2.f32 %v681_v22  ;;  %v2878_v58 = vld [vmem:[#allocation14_spill] sm:$0xff] }
 0x279   :  { %1472 = vpow2.f32 %v677_v61  ;;  %v2893_v22 = vld [vmem:[#allocation18_spill] sm:$0xff] }
 0x27a   :  { %1060 = vst.msk [vmem:[#allocation5 + $0x58] sm:$0xff] %vm2855_vm6, %v1044_v56  ;;  %v2879_v56 = vld [vmem:[#allocation16_spill] sm:$0xff]  ;;  %1474 = vpow2.f32 %v697_v55  ;;  %v2894_v13 = vsub.f32 %v2893_v22, %v2196_v9  ;;  %v2896_v61 = vld [vmem:[#allocation22_spill] sm:$0xff]  ;;  %vm2903_vm6 = vmmov %vm2859_vm0 }
 0x27b   :  { %v1028_v60 = vpop.xlane.xlu1 %1027 }
 0x27c   :  { %v1046_v1 = vadd.f32 %v1028_v60, %v982_v63  ;;  %v2880_v63 = vsub.f32 %v2878_v58, %v2879_v56  ;;  %v689_v16 = vmul.f32 1.442695, %v2894_v13  ;;  %v649_v56 = vld [vmem:[#allocation3 + $0x30] sm:$0xff] }
 0x27e   :  { %1062 = vst.msk [vmem:[#allocation5 + $0x68] sm:$0xff] %vm2845_vm2, %v1046_v1  ;;  %v693_v60 = vmul.f32 1.442695, %v2880_v63  ;;  %v652_v63 = vld [vmem:[#allocation3 + $0x48] sm:$0xff]  ;;  %vm2904_vm2 = vmmov %vm2859_vm0 }
 0x27f   :  { %v1032_v4 = vpop.xlane.xlu1 %1031 }
 0x280   :  { %v1461_v19 = vpop.eup %1460  ;;  %v1048_v23 = vadd.f32 %v1032_v4, %v984_v21  ;;  %v643_v21 = vld [vmem:[#allocation3] sm:$0xff]  ;;  %1476 = vpow2.f32 %v693_v60  ;;  %v1212_v60 = vmax.f32 %v2528_v41, 1.0 }
 0x281   :  { %637 = vadd.xlane.f32.xlu0 %v1461_v19  ;;  %v1463_v28 = vpop.eup %1462  ;;  %v2881_v19 = vld [vmem:[#allocation17_spill] sm:$0xff] }
 0x282   :  { %1064 = vst.msk [vmem:[#allocation5 + $0x78] sm:$0xff] %vm2856_vm5, %v1048_v23  ;;  %v1465_v50 = vpop.eup %1464  ;;  %v709_v1 = vmul.f32 %v1463_v28, %v645_v11  ;;  %v2882_v23 = vld [vmem:[#allocation19_spill] sm:$0xff]  ;;  %v2897_v28 = vsub.f32 %v2895_v59, %v2896_v61  ;;  %vm2905_vm5 = vmmov %vm2859_vm0  ;;  %v650_v59 = vld [vmem:[#allocation3 + $0x38] sm:$0xff] }
 0x283   :  { %v908_v7 = vpop.xlane.xlu1 %907  ;;  %v1467_v4 = vpop.eup %1466  ;;  %v1084_v61 = vld [vmem:[#allocation4] sm:$0xff] }
 0x284   :  { %v938_v45 = vadd.f32 %v908_v7, %v874_v27  ;;  %v2883_v27 = vsub.f32 %v2881_v19, %v2882_v23  ;;  %v1469_v39 = vpop.eup %1468  ;;  %v705_v37 = vmul.f32 1.442695, %v2897_v28 }
 0x285   :  { %917 = vadd.xlane.f32.xlu0 %v895_v10  ;;  %v653_v10 = vld [vmem:[#allocation3 + $0x50] sm:$0xff]  ;;  %v1471_v8 = vpop.eup %1470 }
 0x286   :  { %954 = vst.msk [vmem:[#allocation4 + $0x8] sm:$0xff] %vm2857_vm4, %v938_v45  ;;  %v687_v7 = vmul.f32 1.442695, %v2883_v27  ;;  %v1473_v46 = vpop.eup %1472 }
 0x287   :  { %v912_v44 = vpop.xlane.xlu1 %911 }
 0x288   :  { %v940_v0 = vadd.f32 %v912_v44, %v876_v53  ;;  %v707_v44 = vmul.f32 %v1465_v50, %v643_v21  ;;  %1478 = vpow2.f32 %v687_v7  ;;  %v2899_v21 = vsub.f32 %v2223_v43, %v2235_v47  ;;  %v647_v47 = vld [vmem:[#allocation3 + $0x20] sm:$0xff] }
 0x289   :  { %921 = vadd.xlane.f32.xlu0 %v897_v20 }
 0x28a   :  { %956 = vst.msk [vmem:[#allocation4 + $0x18] sm:$0xff] %vm2858_vm8, %v940_v0  ;;  %v717_v0 = vmul.f32 %v1467_v4, %v653_v10  ;;  %v685_v4 = vmul.f32 1.442695, %v2899_v21  ;;  %v657_v10 = vld [vmem:[#allocation3 + $0x70] sm:$0xff]  ;;  %vm2906_vm8 = vmmov %vm2859_vm0  ;;  %v648_v21 = vld [vmem:[#allocation3 + $0x28] sm:$0xff] }
 0x28b   :  { %v916_v62 = vpop.xlane.xlu1 %915 }
 0x28c   :  { %v942_v3 = vadd.f32 %v916_v62, %v878_v49  ;;  %v2885_v49 = vld [vmem:[#allocation20_spill] sm:$0xff] }
 0x28d   :  { %925 = vadd.xlane.f32.xlu0 %v899_v12  ;;  %v2886_v62 = vsub.f32 %v2885_v49, %v2212_v35  ;;  %v2518_v35 = vld [vmem:[#allocation5 + $0x10] sm:$0xff] }
 0x28e   :  { %958 = vst.msk [vmem:[#allocation4 + $0x28] sm:$0xff] %vm2859_vm0, %v942_v3  ;;  %vm1262_vm4 = vcmp.gt.f32.partialorder %v2518_v35, 0.0  ;;  %vm1260_vm0 = vcmp.gt.f32.partialorder %v2528_v41, 0.0 }
 0x28f   :  { %v703_v3 = vmul.f32 1.442695, %v2886_v62  ;;  %v2542_v62 = vld [vmem:[#allocation5 + $0x18] sm:$0xff] }
 0x291   :  { %929 = vadd.xlane.f32.xlu0 %v901_v34  ;;  %1480 = vpow2.f32 %v703_v3 }
 0x292   :  { %1482 = vpow2.f32 %v683_v5 }
 0x295   :  { %933 = vadd.xlane.f32.xlu0 %v903_v2  ;;  %v651_v2 = vld [vmem:[#allocation3 + $0x40] sm:$0xff] }
 0x296   :  { %v715_v6 = vmul.f32 %v1469_v39, %v651_v2 }
 0x29b   :  { %v910_v36 = vpop.xlane.xlu0 %909 }
 0x29c   :  { %v939_v24 = vadd.f32 %v910_v36, %v875_v18  ;;  %v646_v36 = vld [vmem:[#allocation3 + $0x18] sm:$0xff] }
 0x29d   :  { %v710_v15 = vmul.f32 %v1471_v8, %v646_v36  ;;  %v1215_v8 = vmax.f32 %v2542_v62, 1.0 }
 0x29e   :  { %955 = vst.msk [vmem:[#allocation4 + $0x10] sm:$0xff] %vm2867_vm1, %v939_v24 }
 0x29f   :  { %v914_v40 = vpop.xlane.xlu0 %913 }
 0x2a0   :  { %v941_v32 = vadd.f32 %v914_v40, %v877_v26  ;;  %v644_v26 = vld [vmem:[#allocation3 + $0x8] sm:$0xff]  ;;  %v1475_v40 = vpop.eup %1474 }
 0x2a1   :  { %v708_v30 = vmul.f32 %v1473_v46, %v644_v26  ;;  %v1477_v48 = vpop.eup %1476  ;;  %v718_v11 = vmul.f32 %v1475_v40, %v654_v54 }
 0x2a2   :  { %957 = vst.msk [vmem:[#allocation4 + $0x20] sm:$0xff] %vm2871_vm14, %v941_v32  ;;  %v1214_v32 = vmax.f32 %v2518_v35, 1.0  ;;  %v1479_v50 = vpop.eup %1478  ;;  %v716_v23 = vmul.f32 %v1477_v48, %v652_v63  ;;  %vm2907_vm14 = vmmov %vm2867_vm1 }
 0x2a3   :  { %v713_v19 = vmul.f32 %v1479_v50, %v649_v56  ;;  %v1481_v27 = vpop.eup %1480 }
 0x2a4   :  { %v721_v43 = vmul.f32 %v1481_v27, %v657_v10  ;;  %v1103_v10 = vld [vmem:[#allocation2 + $0x18] sm:$0xff] }
 0x2a9   :  { %v616_v45 = vpop.xlane.xlu0 %615 }
 0x2aa   :  { %v725_v53 = vadd.f32 %v709_v1, %v616_v45 }
 0x2ac   :  { %742 = vst.msk [vmem:[#allocation3 + $0x10] sm:$0xff] %vm2884_vm7, %v725_v53  ;;  %vm2908_vm7 = vmmov %vm2867_vm1 }
 0x2ad   :  { %v612_v20 = vpop.xlane.xlu1 %611 }
 0x2ae   :  { %v632_v12 = vpop.xlane.xlu0 %631  ;;  %v723_v34 = vadd.f32 %v707_v44, %v612_v20 }
 0x2af   :  { %v733_v57 = vadd.f32 %v717_v0, %v632_v12  ;;  %v1483_v0 = vpop.eup %1482 }
 0x2b0   :  { %740 = vst.msk [vmem:[#allocation3] sm:$0xff] %vm2889_vm12, %v723_v34  ;;  %v1102_v34 = vld [vmem:[#allocation2 + $0x10] sm:$0xff]  ;;  %v711_v42 = vmul.f32 %v1483_v0, %v647_v47  ;;  %vm2909_vm12 = vmmov %vm2867_vm1 }
 0x2b1   :  { %750 = vst.msk [vmem:[#allocation3 + $0x50] sm:$0xff] %vm2890_vm11, %v733_v57  ;;  %vm2910_vm11 = vmmov %vm2867_vm1 }
 0x2b2   :  { %v628_v18 = vpop.xlane.xlu0 %627 }
 0x2b3   :  { %v1118_v24 = vld [vmem:[#allocation3 + $0x10] sm:$0xff]  ;;  %v731_v31 = vadd.f32 %v715_v6, %v628_v18  ;;  %v2544_v6 = vld [vmem:[#allocation5 + $0x8] sm:$0xff] }
 0x2b4   :  { %1484 = vlog2.f32 %v1118_v24  ;;  %v655_v24 = vld [vmem:[#allocation3 + $0x60] sm:$0xff] }
 0x2b5   :  { %748 = vst.msk [vmem:[#allocation3 + $0x40] sm:$0xff] %vm2892_vm9, %v731_v31  ;;  %v618_v33 = vpop.xlane.xlu1 %617  ;;  %v1100_v31 = vld [vmem:[#allocation2] sm:$0xff]  ;;  %vm1263_vm9 = vcmp.gt.f32.partialorder %v2542_v62, 0.0 }
 0x2b6   :  { %v726_v29 = vadd.f32 %v710_v15, %v618_v33  ;;  %v1086_v15 = vld [vmem:[#allocation4 + $0x10] sm:$0xff] }
 0x2b7   :  { %v1116_v51 = vld [vmem:[#allocation3] sm:$0xff] }
 0x2b8   :  { %1486 = vlog2.f32 %v1116_v51  ;;  %743 = vst.msk [vmem:[#allocation3 + $0x18] sm:$0xff] %vm2898_vm10, %v726_v29  ;;  %v658_v29 = vld [vmem:[#allocation3 + $0x78] sm:$0xff]  ;;  %vm2911_vm10 = vmmov %vm2867_vm1 }
 0x2b9   :  { %1488 = vpow2.f32 %v699_v52  ;;  %v614_v55 = vpop.xlane.xlu0 %613 }
 0x2ba   :  { %1490 = vrcp.f32 %v1214_v32  ;;  %v724_v58 = vadd.f32 %v708_v30, %v614_v55  ;;  %v634_v9 = vpop.xlane.xlu1 %633  ;;  %v1213_v32 = vmax.f32 %v2544_v6, 1.0 }
 0x2bb   :  { %1492 = vpow2.f32 %v689_v16  ;;  %v734_v1 = vadd.f32 %v718_v11, %v634_v9 }
 0x2bc   :  { %1494 = vpow2.f32 %v705_v37  ;;  %741 = vst.msk [vmem:[#allocation3 + $0x8] sm:$0xff] %vm2900_vm13, %v724_v58  ;;  %vm1261_vm13 = vcmp.gt.f32.partialorder %v2544_v6, 0.0 }
 0x2bd   :  { %751 = vst.msk [vmem:[#allocation3 + $0x58] sm:$0xff] %vm2901_vm3, %v734_v1  ;;  %v624_v7 = vpop.xlane.xlu0 %623  ;;  %1496 = vrcp.f32 %v1212_v60  ;;  %vm2912_vm3 = vmmov %vm2867_vm1 }
 0x2be   :  { %v630_v45 = vpop.xlane.xlu1 %629  ;;  %v729_v53 = vadd.f32 %v713_v19, %v624_v7  ;;  %1498 = vpow2.f32 %v685_v4 }
 0x2bf   :  { %v732_v44 = vadd.f32 %v716_v23, %v630_v45  ;;  %v1119_v20 = vld [vmem:[#allocation3 + $0x18] sm:$0xff]  ;;  %v2555_v23 = vld [vmem:[#allocation5 + $0x20] sm:$0xff] }
 0x2c0   :  { %1500 = vlog2.f32 %v1119_v20  ;;  %746 = vst.msk [vmem:[#allocation3 + $0x30] sm:$0xff] %vm2902_vm15, %v729_v53  ;;  %v2561_v53 = vld [vmem:[#allocation5 + $0x48] sm:$0xff]  ;;  %vm2913_vm15 = vmmov %vm2867_vm1 }
 0x2c1   :  { %v1485_v49 = vpop.eup %1484  ;;  %749 = vst.msk [vmem:[#allocation3 + $0x48] sm:$0xff] %vm2903_vm6, %v732_v44  ;;  %vm2914_vm6 = vmmov %vm2867_vm1 }
 0x2c2   :  { %v1137_v3 = vmul.f32 0.6931472, %v1485_v49  ;;  %v640_v12 = vpop.xlane.xlu1 %639 }
 0x2c3   :  { %v1117_v39 = vld [vmem:[#allocation3 + $0x8] sm:$0xff]  ;;  %v737_v57 = vadd.f32 %v721_v43, %v640_v12  ;;  %v1216_v43 = vmax.f32 %v2555_v23, 1.0 }
 0x2c4   :  { %v1166_v17 = vadd.f32 %v1137_v3, %v1102_v34  ;;  %1502 = vlog2.f32 %v1117_v39  ;;  %v1127_v37 = vld [vmem:[#allocation3 + $0x58] sm:$0xff]  ;;  %v1101_v12 = vld [vmem:[#allocation2 + $0x8] sm:$0xff]  ;;  %v1221_v34 = vmax.f32 %v2561_v53, 1.0 }
 0x2c5   :  { %v1487_v2 = vpop.eup %1486  ;;  %754 = vst.msk [vmem:[#allocation3 + $0x70] sm:$0xff] %vm2904_vm2, %v737_v57  ;;  %v620_v36 = vpop.xlane.xlu0 %619  ;;  %1504 = vrcp.f32 %v1215_v8  ;;  %v880_v57 = vld [vmem:[#allocation4 + $0x38] sm:$0xff]  ;;  %vm2915_vm2 = vmmov %vm2867_vm1 }
 0x2c6   :  { %v1489_v5 = vpop.eup %1488  ;;  %v1133_v18 = vmul.f32 0.6931472, %v1487_v2  ;;  %v1182_v38 = vmul.f32 %v1166_v17, %v2518_v35  ;;  %v727_v52 = vadd.f32 %v711_v42, %v620_v36  ;;  %v2572_v2 = vld [vmem:[#allocation5 + $0x58] sm:$0xff] }
 0x2c7   :  { %v1491_v46 = vpop.eup %1490  ;;  %v719_v54 = vmul.f32 %v1489_v5, %v655_v24  ;;  %v1087_v17 = vld [vmem:[#allocation4 + $0x18] sm:$0xff] }
 0x2c8   :  { %v1164_v26 = vadd.f32 %v1133_v18, %v1100_v31  ;;  %v1493_v40 = vpop.eup %1492  ;;  %v1198_v51 = vsub.f32 %v1086_v15, %v1182_v38  ;;  %v1125_v33 = vld [vmem:[#allocation3 + $0x48] sm:$0xff]  ;;  %744 = vst.msk [vmem:[#allocation3 + $0x20] sm:$0xff] %vm2905_vm5, %v727_v52  ;;  %v1223_v52 = vmax.f32 %v2572_v2, 1.0  ;;  %vm2916_vm5 = vmmov %vm2867_vm1 }
 0x2c9   :  { %v1495_v22 = vpop.eup %1494  ;;  %v636_v16 = vpop.xlane.xlu0 %635  ;;  %1506 = vlog2.f32 %v1125_v33  ;;  %v714_v58 = vmul.f32 %v1493_v40, %v650_v59  ;;  %v882_v31 = vld [vmem:[#allocation4 + $0x48] sm:$0xff] }
 0x2ca   :  { %v1180_v13 = vmul.f32 %v1164_v26, %v2528_v41  ;;  %v1246_v28 = vmul.f32 %v1491_v46, %v1198_v51  ;;  %v735_v30 = vadd.f32 %v719_v54, %v636_v16  ;;  %v1497_v55 = vpop.eup %1496  ;;  %1508 = vrcp.f32 %v1213_v32  ;;  %v1085_v46 = vld [vmem:[#allocation4 + $0x8] sm:$0xff] }
 0x2cb   :  { %v722_v50 = vmul.f32 %v1495_v22, %v658_v29  ;;  %v1499_v9 = vpop.eup %1498  ;;  %1510 = vlog2.f32 %v1127_v37  ;;  %v2582_v37 = vld [vmem:[#allocation5 + $0x28] sm:$0xff] }
 0x2cc   :  { %v1196_v48 = vsub.f32 %v1084_v61, %v1180_v13  ;;  %v1278_v11 = vsel %vm1262_vm4, %v1246_v28, 0.0  ;;  %752 = vst.msk [vmem:[#allocation3 + $0x60] sm:$0xff] %vm2906_vm8, %v735_v30  ;;  %v712_v41 = vmul.f32 %v1499_v9, %v648_v21  ;;  %v2579_v13 = vld [vmem:[#allocation5 + $0x38] sm:$0xff]  ;;  %v1217_v21 = vmax.f32 %v2582_v37, 1.0 }
 0x2cd   :  { %v1294_v56 = vmul.f32 -1.0, %v1278_v11  ;;  %v642_v60 = vpop.xlane.xlu0 %641  ;;  %v626_v1 = vpop.xlane.xlu1 %625  ;;  %v1219_v11 = vmax.f32 %v2579_v13, 1.0  ;;  %vm1264_vm4 = vcmp.gt.f32.partialorder %v2555_v23, 0.0  ;;  %vm1269_vm8 = vcmp.gt.f32.partialorder %v2561_v53, 0.0 }
 0x2ce   :  { %v1244_v63 = vmul.f32 %v1497_v55, %v1196_v48  ;;  %v1501_v4 = vpop.eup %1500  ;;  %v738_v19 = vadd.f32 %v722_v50, %v642_v60  ;;  %v730_v35 = vadd.f32 %v714_v58, %v626_v1  ;;  %v1109_v55 = vld [vmem:[#allocation2 + $0x48] sm:$0xff]  ;;  %v2590_v50 = vld [vmem:[#allocation5 + $0x78] sm:$0xff]  ;;  %v1104_v1 = vld [vmem:[#allocation2 + $0x20] sm:$0xff] }
 0x2cf   :  { %1310 = vst.msk [vmem:[%s2703_s4 + $0x10] sm:$0xff] %vm2867_vm1, %v1294_v56  ;;  %v1139_v7 = vmul.f32 0.6931472, %v1501_v4  ;;  %v1120_v45 = vld [vmem:[#allocation3 + $0x20] sm:$0xff]  ;;  %v886_v4 = vld [vmem:[#allocation4 + $0x68] sm:$0xff] }
 0x2d0   :  { %v1276_v27 = vsel %vm1260_vm0, %v1244_v63, 0.0  ;;  %1512 = vlog2.f32 %v1120_v45  ;;  %755 = vst.msk [vmem:[#allocation3 + $0x78] sm:$0xff] %vm2907_vm14, %v738_v19  ;;  %v1111_v19 = vld [vmem:[#allocation2 + $0x58] sm:$0xff]  ;;  %vm2917_vm0 = vmmov %vm2867_vm1  ;;  %vm1271_vm1 = vcmp.gt.f32.partialorder %v2572_v2, 0.0 }
 0x2d1   :  { %v1292_v44 = vmul.f32 -1.0, %v1276_v27  ;;  %747 = vst.msk [vmem:[#allocation3 + $0x38] sm:$0xff] %vm2908_vm7, %v730_v35  ;;  %v1503_v0 = vpop.eup %1502  ;;  %v1167_v20 = vadd.f32 %v1139_v7, %v1103_v10  ;;  %v622_v49 = vpop.xlane.xlu1 %621  ;;  %1514 = vrcp.f32 %v1216_v43  ;;  %v1227_v35 = vmax.f32 %v2590_v50, 1.0  ;;  %v888_v43 = vld [vmem:[#allocation4 + $0x78] sm:$0xff]  ;;  %vm2918_vm14 = vmmov %vm2917_vm0 }
 0x2d2   :  { %v1135_v47 = vmul.f32 0.6931472, %v1503_v0  ;;  %v728_v3 = vadd.f32 %v712_v41, %v622_v49  ;;  %v1505_v18 = vpop.eup %1504  ;;  %1516 = vrcp.f32 %v1221_v34  ;;  %vm2919_vm7 = vmmov %vm2917_vm0 }
 0x2d3   :  { %1308 = vst.msk [vmem:[%s2703_s4] sm:$0xff] %vm2909_vm12, %v1292_v44  ;;  %v1183_v39 = vmul.f32 %v1167_v20, %v2542_v62  ;;  %v884_v62 = vld [vmem:[#allocation4 + $0x58] sm:$0xff]  ;;  %v1088_v20 = vld [vmem:[#allocation4 + $0x20] sm:$0xff]  ;;  %vm2920_vm12 = vmmov %vm2917_vm0 }
 0x2d4   :  { %v1165_v42 = vadd.f32 %v1135_v47, %v1101_v12  ;;  %745 = vst.msk [vmem:[#allocation3 + $0x28] sm:$0xff] %vm2910_vm11, %v728_v3  ;;  %vm1267_vm11 = vcmp.gt.f32.partialorder %v2579_v13, 0.0 }
 0x2d5   :  { %v1199_v5 = vsub.f32 %v1087_v17, %v1183_v39  ;;  %v920_v8 = vpop.xlane.xlu1 %919 }
 0x2d6   :  { %v1181_v36 = vmul.f32 %v1165_v42, %v2544_v6  ;;  %v944_v24 = vadd.f32 %v920_v8, %v880_v57  ;;  %v1507_v38 = vpop.eup %1506 }
 0x2d7   :  { %v1247_v15 = vmul.f32 %v1505_v18, %v1199_v5  ;;  %v1131_v26 = vld [vmem:[#allocation3 + $0x78] sm:$0xff]  ;;  %v1509_v51 = vpop.eup %1508  ;;  %v1151_v59 = vmul.f32 0.6931472, %v1507_v38 }
 0x2d8   :  { %v1123_v40 = vld [vmem:[#allocation3 + $0x38] sm:$0xff]  ;;  %v1197_v32 = vsub.f32 %v1085_v46, %v1181_v36  ;;  %1518 = vlog2.f32 %v1131_v26  ;;  %960 = vst.msk [vmem:[#allocation4 + $0x38] sm:$0xff] %vm2911_vm10, %v944_v24  ;;  %v1511_v22 = vpop.eup %1510  ;;  %vm1275_vm10 = vcmp.gt.f32.partialorder %v2590_v50, 0.0 }
 0x2d9   :  { %v1279_v33 = vsel %vm1263_vm9, %v1247_v15, 0.0  ;;  %1520 = vlog2.f32 %v1123_v40  ;;  %v924_v54 = vpop.xlane.xlu1 %923  ;;  %v1155_v58 = vmul.f32 0.6931472, %v1511_v22  ;;  %v1173_v63 = vadd.f32 %v1151_v59, %v1109_v55  ;;  %v1107_v38 = vld [vmem:[#allocation2 + $0x38] sm:$0xff]  ;;  %v1089_v55 = vld [vmem:[#allocation4 + $0x28] sm:$0xff] }
 0x2da   :  { %v1295_v16 = vmul.f32 -1.0, %v1279_v33  ;;  %v1245_v29 = vmul.f32 %v1509_v51, %v1197_v32  ;;  %v946_v61 = vadd.f32 %v924_v54, %v882_v31  ;;  %1522 = vrcp.f32 %v1223_v52  ;;  %v1115_v40 = vld [vmem:[#allocation2 + $0x78] sm:$0xff] }
 0x2db   :  { %v1121_v28 = vld [vmem:[#allocation3 + $0x28] sm:$0xff]  ;;  %v1175_v7 = vadd.f32 %v1155_v58, %v1111_v19  ;;  %v1189_v44 = vmul.f32 %v1173_v63, %v2561_v53  ;;  %vm1265_vm9 = vcmp.gt.f32.partialorder %v2582_v37, 0.0 }
 0x2dc   :  { %1311 = vst.msk [vmem:[%s2703_s4 + $0x18] sm:$0xff] %vm2912_vm3, %v1295_v16  ;;  %v1277_v30 = vsel %vm1261_vm13, %v1245_v29, 0.0  ;;  %1524 = vlog2.f32 %v1121_v28  ;;  %vm2921_vm13 = vmmov %vm2917_vm0 }
 0x2dd   :  { %962 = vst.msk [vmem:[#allocation4 + $0x48] sm:$0xff] %vm2913_vm15, %v946_v61  ;;  %v1513_v48 = vpop.eup %1512  ;;  %v1293_v6 = vmul.f32 -1.0, %v1277_v30  ;;  %v928_v9 = vpop.xlane.xlu1 %927  ;;  %1526 = vrcp.f32 %v1219_v11  ;;  %v1191_v39 = vmul.f32 %v1175_v7, %v2572_v2  ;;  %vm2922_vm3 = vmmov %vm2917_vm0 }
 0x2de   :  { %v1141_v56 = vmul.f32 0.6931472, %v1513_v48  ;;  %v948_v60 = vadd.f32 %v928_v9, %v884_v62  ;;  %v1515_v0 = vpop.eup %1514  ;;  %1528 = vrcp.f32 %v1217_v21  ;;  %vm2923_vm15 = vmmov %vm2917_vm0 }
 0x2df   :  { %1309 = vst.msk [vmem:[%s2703_s4 + $0x8] sm:$0xff] %vm2914_vm6, %v1293_v6  ;;  %v1517_v47 = vpop.eup %1516  ;;  %1530 = vrcp.f32 %v1227_v35  ;;  %v1091_v59 = vld [vmem:[#allocation4 + $0x38] sm:$0xff]  ;;  %vm2924_vm6 = vmmov %vm2917_vm0 }
 0x2e0   :  { %v1168_v27 = vadd.f32 %v1141_v56, %v1104_v1  ;;  %964 = vst.msk [vmem:[#allocation4 + $0x58] sm:$0xff] %vm2915_vm2, %v948_v60  ;;  %v672_v60 = vsub.f32 %v2243_v25, %v2254_v14  ;;  %v1122_v14 = vld [vmem:[#allocation3 + $0x30] sm:$0xff]  ;;  %v1124_v25 = vld [vmem:[#allocation3 + $0x40] sm:$0xff]  ;;  %vm2925_vm2 = vmmov %vm2917_vm0 }
 0x2e1   :  { %v932_v45 = vpop.xlane.xlu1 %931 }
 0x2e2   :  { %v1184_v10 = vmul.f32 %v1168_v27, %v2555_v23  ;;  %v950_v41 = vadd.f32 %v932_v45, %v886_v4  ;;  %v1105_v23 = vld [vmem:[#allocation2 + $0x28] sm:$0xff]  ;;  %v701_v27 = vmul.f32 1.442695, %v672_v60 }
 0x2e4   :  { %v1093_v49 = vld [vmem:[#allocation4 + $0x48] sm:$0xff]  ;;  %v1200_v3 = vsub.f32 %v1088_v20, %v1184_v10  ;;  %966 = vst.msk [vmem:[#allocation4 + $0x68] sm:$0xff] %vm2916_vm5, %v950_v41  ;;  %1532 = vpow2.f32 %v701_v27  ;;  %v2639_v10 = vld [vmem:[#allocation5 + $0x30] sm:$0xff]  ;;  %v1128_v41 = vld [vmem:[#allocation3 + $0x60] sm:$0xff] }
 0x2e5   :  { %v1205_v12 = vsub.f32 %v1093_v49, %v1189_v44  ;;  %v1519_v34 = vpop.eup %1518  ;;  %v936_v57 = vpop.xlane.xlu1 %935  ;;  %1534 = vlog2.f32 %v1122_v14  ;;  %v656_v44 = vld [vmem:[#allocation3 + $0x68] sm:$0xff]  ;;  %v2642_v49 = vld [vmem:[#allocation5 + $0x40] sm:$0xff]  ;;  %vm2926_vm5 = vmmov %vm2917_vm0 }
 0x2e6   :  { %v1521_v17 = vpop.eup %1520  ;;  %v1248_v42 = vmul.f32 %v1515_v0, %v1200_v3  ;;  %v1163_v5 = vmul.f32 0.6931472, %v1519_v34  ;;  %v952_v18 = vadd.f32 %v936_v57, %v888_v43  ;;  %1536 = vlog2.f32 %v1124_v25  ;;  %v879_v34 = vld [vmem:[#allocation4 + $0x30] sm:$0xff]  ;;  %v1112_v27 = vld [vmem:[#allocation2 + $0x60] sm:$0xff] }
 0x2e7   :  { %v1253_v8 = vmul.f32 %v1517_v47, %v1205_v12  ;;  %v1147_v36 = vmul.f32 0.6931472, %v1521_v17  ;;  %v1095_v24 = vld [vmem:[#allocation4 + $0x58] sm:$0xff]  ;;  %v1523_v31 = vpop.eup %1522  ;;  %v1218_v0 = vmax.f32 %v2639_v10, 1.0  ;;  %v1130_v12 = vld [vmem:[#allocation3 + $0x70] sm:$0xff] }
 0x2e8   :  { %v1280_v52 = vsel %vm1264_vm4, %v1248_v42, 0.0  ;;  %v1207_v15 = vsub.f32 %v1095_v24, %v1191_v39  ;;  %968 = vst.msk [vmem:[#allocation4 + $0x78] sm:$0xff] %vm2917_vm0, %v952_v18  ;;  %v1179_v16 = vadd.f32 %v1163_v5, %v1115_v40  ;;  %v1220_v39 = vmax.f32 %v2642_v49, 1.0  ;;  %v2645_v57 = vld [vmem:[#allocation5 + $0x50] sm:$0xff]  ;;  %vm2927_vm4 = vmmov %vm2917_vm0 }
 0x2e9   :  { %v1285_v46 = vsel %vm1269_vm8, %v1253_v8, 0.0  ;;  %v1525_v26 = vpop.eup %1524  ;;  %v1296_v32 = vmul.f32 -1.0, %v1280_v52  ;;  %v1171_v51 = vadd.f32 %v1147_v36, %v1107_v38  ;;  %v1222_v18 = vmax.f32 %v2645_v57, 1.0  ;;  %v881_v36 = vld [vmem:[#allocation4 + $0x40] sm:$0xff]  ;;  %v1106_v24 = vld [vmem:[#allocation2 + $0x30] sm:$0xff] }
 0x2ea   :  { %v1301_v33 = vmul.f32 -1.0, %v1285_v46  ;;  %v1143_v54 = vmul.f32 0.6931472, %v1525_v26  ;;  %v1255_v22 = vmul.f32 %v1523_v31, %v1207_v15  ;;  %v1527_v30 = vpop.eup %1526  ;;  %v1195_v48 = vmul.f32 %v1179_v16, %v2590_v50  ;;  %v2650_v31 = vld [vmem:[#allocation5 + $0x60] sm:$0xff] }
 0x2eb   :  { %1312 = vst.msk [vmem:[%s2703_s4 + $0x20] sm:$0xff] %vm2918_vm14, %v1296_v32  ;;  %v1187_v53 = vmul.f32 %v1171_v51, %v2579_v13  ;;  %v1529_v58 = vpop.eup %1528  ;;  %v883_v32 = vld [vmem:[#allocation4 + $0x50] sm:$0xff]  ;;  %v1224_v51 = vmax.f32 %v2650_v31, 1.0  ;;  %vm1266_vm8 = vcmp.gt.f32.partialorder %v2639_v10, 0.0  ;;  %vm2928_vm14 = vmmov %vm2917_vm0 }
 0x2ec   :  { %1317 = vst.msk [vmem:[%s2703_s4 + $0x48] sm:$0xff] %vm2919_vm7, %v1301_v33  ;;  %v1169_v29 = vadd.f32 %v1143_v54, %v1105_v23  ;;  %v1287_v61 = vsel %vm1271_vm1, %v1255_v22, 0.0  ;;  %v1531_v63 = vpop.eup %1530  ;;  %v2653_v33 = vld [vmem:[#allocation5 + $0x70] sm:$0xff]  ;;  %v1108_v54 = vld [vmem:[#allocation2 + $0x40] sm:$0xff]  ;;  %v2656_v22 = vld [vmem:[#allocation5 + $0x68] sm:$0xff]  ;;  %vm1268_vm1 = vcmp.gt.f32.partialorder %v2642_v49, 0.0 }
 0x2ed   :  { %v1203_v28 = vsub.f32 %v1091_v59, %v1187_v53  ;;  %v1303_v62 = vmul.f32 -1.0, %v1287_v61  ;;  %vm2929_vm7 = vmmov %vm2917_vm0 }
 0x2ee   :  { %v1185_v2 = vmul.f32 %v1169_v29, %v2582_v37  ;;  %v1126_v37 = vld [vmem:[#allocation3 + $0x50] sm:$0xff] }
 0x2ef   :  { %v1251_v11 = vmul.f32 %v1527_v30, %v1203_v28  ;;  %1319 = vst.msk [vmem:[%s2703_s4 + $0x58] sm:$0xff] %vm2920_vm12, %v1303_v62  ;;  %v1099_v6 = vld [vmem:[#allocation4 + $0x78] sm:$0xff]  ;;  %1538 = vlog2.f32 %v1126_v37  ;;  %v1226_v28 = vmax.f32 %v2653_v33, 1.0  ;;  %v885_v30 = vld [vmem:[#allocation4 + $0x60] sm:$0xff]  ;;  %vm1270_vm12 = vcmp.gt.f32.partialorder %v2645_v57, 0.0 }
 0x2f0   :  { %v1201_v9 = vsub.f32 %v1089_v55, %v1185_v2  ;;  %v1211_v56 = vsub.f32 %v1099_v6, %v1195_v48  ;;  %1540 = vlog2.f32 %v1128_v41  ;;  %v1110_v2 = vld [vmem:[#allocation2 + $0x50] sm:$0xff]  ;;  %v1225_v48 = vmax.f32 %v2656_v22, 1.0 }
 0x2f1   :  { %v1283_v1 = vsel %vm1267_vm11, %v1251_v11, 0.0  ;;  %v1533_v50 = vpop.eup %1532  ;;  %1542 = vrcp.f32 %v1218_v0  ;;  %vm2930_vm11 = vmmov %vm2917_vm0 }
 0x2f2   :  { %v1249_v21 = vmul.f32 %v1529_v58, %v1201_v9  ;;  %v1299_v4 = vmul.f32 -1.0, %v1283_v1  ;;  %v1259_v19 = vmul.f32 %v1531_v63, %v1211_v56  ;;  %v720_v20 = vmul.f32 %v1533_v50, %v656_v44  ;;  %v1535_v3 = vpop.eup %1534 }
 0x2f3   :  { %v1145_v42 = vmul.f32 0.6931472, %v1535_v3  ;;  %1544 = vlog2.f32 %v1130_v12  ;;  %v1537_v8 = vpop.eup %1536 }
 0x2f4   :  { %v1281_v35 = vsel %vm1265_vm9, %v1249_v21, 0.0  ;;  %1315 = vst.msk [vmem:[%s2703_s4 + $0x38] sm:$0xff] %vm2921_vm13, %v1299_v4  ;;  %v1291_v13 = vsel %vm1275_vm10, %v1259_v19, 0.0  ;;  %1546 = vrcp.f32 %v1220_v39  ;;  %v1149_v46 = vmul.f32 0.6931472, %v1537_v8  ;;  %v887_v4 = vld [vmem:[#allocation4 + $0x70] sm:$0xff]  ;;  %vm2931_vm10 = vmmov %vm2917_vm0 }
 0x2f5   :  { %v1297_v7 = vmul.f32 -1.0, %v1281_v35  ;;  %v1307_v45 = vmul.f32 -1.0, %v1291_v13  ;;  %v1170_v15 = vadd.f32 %v1145_v42, %v1106_v24  ;;  %1548 = vrcp.f32 %v1222_v18 }
 0x2f6   :  { %v1172_v29 = vadd.f32 %v1149_v46, %v1108_v54  ;;  %vm1272_vm9 = vcmp.gt.f32.partialorder %v2650_v31, 0.0  ;;  %vm1274_vm13 = vcmp.gt.f32.partialorder %v2653_v33, 0.0 }
 0x2f7   :  { %1313 = vst.msk [vmem:[%s2703_s4 + $0x28] sm:$0xff] %vm2922_vm3, %v1297_v7  ;;  %v1186_v53 = vmul.f32 %v1170_v15, %v2639_v10  ;;  %v1097_v15 = vld [vmem:[#allocation4 + $0x68] sm:$0xff]  ;;  %vm1273_vm3 = vcmp.gt.f32.partialorder %v2656_v22, 0.0 }
 0x2f8   :  { %1323 = vst.msk [vmem:[%s2703_s4 + $0x78] sm:$0xff] %vm2923_vm15, %v1307_v45  ;;  %v1188_v63 = vmul.f32 %v1172_v29, %v2642_v49  ;;  %v1113_v49 = vld [vmem:[#allocation2 + $0x68] sm:$0xff]  ;;  %vm2932_vm15 = vmmov %vm2917_vm0 }
 0x2fc   :  { %v1539_v52 = vpop.eup %1538 }
 0x2fd   :  { %v1153_v16 = vmul.f32 0.6931472, %v1539_v52  ;;  %v1541_v61 = vpop.eup %1540 }
 0x2fe   :  { %v1543_v11 = vpop.eup %1542  ;;  %v1157_v9 = vmul.f32 0.6931472, %v1541_v61 }
 0x2ff   :  { %v1174_v6 = vadd.f32 %v1153_v16, %v1110_v2 }
 0x300   :  { %v1545_v1 = vpop.eup %1544  ;;  %v1176_v50 = vadd.f32 %v1157_v9, %v1112_v27 }
 0x301   :  { %v1547_v13 = vpop.eup %1546  ;;  %v1190_v45 = vmul.f32 %v1174_v6, %v2645_v57  ;;  %v1161_v25 = vmul.f32 0.6931472, %v1545_v1 }
 0x302   :  { %v1549_v41 = vpop.eup %1548  ;;  %v1192_v39 = vmul.f32 %v1176_v50, %v2650_v31 }
 0x30a   :  { %v638_v43 = vpop.xlane.xlu0 %637 }
 0x30b   :  { %v736_v47 = vadd.f32 %v720_v20, %v638_v43 }
 0x30d   :  { %753 = vst.msk [vmem:[#allocation3 + $0x68] sm:$0xff] %vm2924_vm6, %v736_v47  ;;  %v1114_v47 = vld [vmem:[#allocation2 + $0x70] sm:$0xff]  ;;  %vm2933_vm6 = vmmov %vm2917_vm0 }
 0x30e   :  { %v918_v17 = vpop.xlane.xlu0 %917 }
 0x30f   :  { %v943_v5 = vadd.f32 %v918_v17, %v879_v34  ;;  %v1178_v17 = vadd.f32 %v1161_v25, %v1114_v47 }
 0x311   :  { %959 = vst.msk [vmem:[#allocation4 + $0x30] sm:$0xff] %vm2925_vm2, %v943_v5  ;;  %v1194_v46 = vmul.f32 %v1178_v17, %v2653_v33  ;;  %vm2934_vm2 = vmmov %vm2917_vm0 }
 0x312   :  { %v922_v38 = vpop.xlane.xlu0 %921 }
 0x313   :  { %v945_v26 = vadd.f32 %v922_v38, %v881_v36 }
 0x314   :  { %v1129_v40 = vld [vmem:[#allocation3 + $0x68] sm:$0xff] }
 0x315   :  { %1550 = vlog2.f32 %v1129_v40  ;;  %961 = vst.msk [vmem:[#allocation4 + $0x40] sm:$0xff] %vm2926_vm5, %v945_v26 }
 0x316   :  { %v926_v23 = vpop.xlane.xlu0 %925  ;;  %1552 = vrcp.f32 %v1224_v51 }
 0x317   :  { %v947_v59 = vadd.f32 %v926_v23, %v883_v32  ;;  %1554 = vrcp.f32 %v1226_v28 }
 0x318   :  { %v1090_v62 = vld [vmem:[#allocation4 + $0x30] sm:$0xff]  ;;  %1556 = vrcp.f32 %v1225_v48 }
 0x319   :  { %v1202_v55 = vsub.f32 %v1090_v62, %v1186_v53  ;;  %963 = vst.msk [vmem:[#allocation4 + $0x50] sm:$0xff] %vm2927_vm4, %v947_v59 }
 0x31a   :  { %v930_v58 = vpop.xlane.xlu0 %929 }
 0x31b   :  { %v1250_v56 = vmul.f32 %v1543_v11, %v1202_v55  ;;  %v949_v60 = vadd.f32 %v930_v58, %v885_v30 }
 0x31c   :  { %v1092_v21 = vld [vmem:[#allocation4 + $0x40] sm:$0xff] }
 0x31d   :  { %v1282_v19 = vsel %vm1266_vm8, %v1250_v56, 0.0  ;;  %v1204_v35 = vsub.f32 %v1092_v21, %v1188_v63  ;;  %965 = vst.msk [vmem:[#allocation4 + $0x60] sm:$0xff] %vm2917_vm0, %v949_v60 }
 0x31e   :  { %v1298_v7 = vmul.f32 -1.0, %v1282_v19  ;;  %v934_v14 = vpop.xlane.xlu0 %933 }
 0x31f   :  { %v1252_v37 = vmul.f32 %v1547_v13, %v1204_v35  ;;  %v951_v44 = vadd.f32 %v934_v14, %v887_v4 }
 0x320   :  { %1314 = vst.msk [vmem:[%s2703_s4 + $0x30] sm:$0xff] %vm2928_vm14, %v1298_v7  ;;  %v1094_v10 = vld [vmem:[#allocation4 + $0x50] sm:$0xff] }
 0x321   :  { %v1284_v0 = vsel %vm1268_vm1, %v1252_v37, 0.0  ;;  %v1206_v20 = vsub.f32 %v1094_v10, %v1190_v45  ;;  %967 = vst.msk [vmem:[#allocation4 + $0x70] sm:$0xff] %vm2929_vm7, %v951_v44 }
 0x322   :  { %v1551_v43 = vpop.eup %1550  ;;  %v1300_v3 = vmul.f32 -1.0, %v1284_v0 }
 0x323   :  { %v1159_v12 = vmul.f32 0.6931472, %v1551_v43  ;;  %v1254_v34 = vmul.f32 %v1549_v41, %v1206_v20  ;;  %v1553_v36 = vpop.eup %1552 }
 0x324   :  { %1316 = vst.msk [vmem:[%s2703_s4 + $0x40] sm:$0xff] %vm2930_vm11, %v1300_v3  ;;  %v1096_v42 = vld [vmem:[#allocation4 + $0x60] sm:$0xff]  ;;  %v1555_v26 = vpop.eup %1554 }
 0x325   :  { %v1177_v5 = vadd.f32 %v1159_v12, %v1113_v49  ;;  %v1286_v8 = vsel %vm1270_vm12, %v1254_v34, 0.0  ;;  %v1208_v18 = vsub.f32 %v1096_v42, %v1192_v39  ;;  %v1557_v54 = vpop.eup %1556 }
 0x326   :  { %v1302_v24 = vmul.f32 -1.0, %v1286_v8 }
 0x327   :  { %v1193_v38 = vmul.f32 %v1177_v5, %v2656_v22  ;;  %v1256_v52 = vmul.f32 %v1553_v36, %v1208_v18 }
 0x328   :  { %1318 = vst.msk [vmem:[%s2703_s4 + $0x50] sm:$0xff] %vm2931_vm10, %v1302_v24  ;;  %v1098_v57 = vld [vmem:[#allocation4 + $0x70] sm:$0xff] }
 0x329   :  { %v1209_v40 = vsub.f32 %v1097_v15, %v1193_v38  ;;  %v1288_v32 = vsel %vm1272_vm9, %v1256_v52, 0.0  ;;  %v1210_v51 = vsub.f32 %v1098_v57, %v1194_v46 }
 0x32a   :  { %v1304_v16 = vmul.f32 -1.0, %v1288_v32 }
 0x32b   :  { %v1257_v23 = vmul.f32 %v1557_v54, %v1209_v40  ;;  %v1258_v53 = vmul.f32 %v1555_v26, %v1210_v51 }
 0x32c   :  { %1320 = vst.msk [vmem:[%s2703_s4 + $0x60] sm:$0xff] %vm2932_vm15, %v1304_v16 }
 0x32d   :  { %v1289_v31 = vsel %vm1273_vm3, %v1257_v23, 0.0  ;;  %v1290_v29 = vsel %vm1274_vm13, %v1258_v53, 0.0 }
 0x32e   :  { %v1305_v59 = vmul.f32 -1.0, %v1289_v31  ;;  %v1306_v61 = vmul.f32 -1.0, %v1290_v29 }
 0x330   :  { %1321 = vst.msk [vmem:[%s2703_s4 + $0x68] sm:$0xff] %vm2933_vm6, %v1305_v59 }
 0x331   :  { %1322 = vst.msk [vmem:[%s2703_s4 + $0x70] sm:$0xff] %vm2934_vm2, %v1306_v61 }

</bundles_post_ra>
